<compile_context>
chip_gen: v7x
topology: tpu7x:2x2x1
jax: 0.10.0
libtpu: 0.0.40
codegen_flags: <defaults>
</compile_context>

<pallas_src>
import math

import jax
import jax.numpy as jnp
from jax.experimental import pallas as pl
from jax.experimental.pallas import tpu as pltpu

_INV_SQRT2 = 1.0 / math.sqrt(2.0)
_SQRT_2_OVER_PI = math.sqrt(2.0 / math.pi)


def _round_up(a, b):
    return ((a + b - 1) // b) * b


def _cdiv(a, b):
    return (a + b - 1) // b


def _vmem_capacity_bytes():
    try:
        return int(pltpu.get_tpu_info().vmem_capacity_bytes)
    except Exception:
        return 64 * 1024 * 1024  # conservative fallback (v7x per-TC VMEM)


def _make_mlp_kernel(approx_gelu: bool):
    def kernel(x_ref, w1_ref, b1_ref, w2_ref, b2_ref, o_ref, acc_ref):
        j = pl.program_id(1)

        # lin1 slab: (tm, D) @ (D, th) on the MXU, f32 accumulation.
        h = jnp.dot(x_ref[...], w1_ref[...], preferred_element_type=jnp.float32)
        h = h + b1_ref[...]
        if approx_gelu:
            # tanh-approx GELU: transcendental goes to the (otherwise idle) EUP
            # slot instead of a multi-op erf VALU polynomial.
            inner = _SQRT_2_OVER_PI * (h + 0.044715 * (h * h * h))
            h = 0.5 * h * (1.0 + jnp.tanh(inner))
        else:
            # Exact erf GELU — matches torch.nn.GELU default bit-for-bit intent.
            h = 0.5 * h * (1.0 + jax.lax.erf(h * _INV_SQRT2))

        # lin2 partial sum for this hidden slab: (tm, th) @ (th, D).
        partial = jnp.dot(h.astype(w2_ref.dtype), w2_ref[...],
                          preferred_element_type=jnp.float32)

        @pl.when(j == 0)
        def _():
            # Fold the output bias into the first partial sum: saves the
            # zero-fill store and one full (tm, D) read-modify-write pass.
            acc_ref[...] = partial + b2_ref[...]

        @pl.when(j > 0)
        def _():
            acc_ref[...] += partial

        @pl.when(j == pl.num_programs(1) - 1)
        def _():
            o_ref[...] = acc_ref[...].astype(o_ref.dtype)

    return kernel


def mlp_block_3d(x, w1, b1, w2, b2, *, tm=None, th=None,
                 compute_dtype=jnp.bfloat16, approx_gelu=False):
    """MLPBlock3D forward: lin2(GELU(lin1(x))).

    x: (B, N, D). w1: (D, H), b1: (H,), w2: (H, D), b2: (D,).
    compute_dtype: operand dtype for x/W1/W2 (default bf16; accumulation stays
    f32 and the output keeps x's original dtype).  Use jnp.float32 (or None)
    for strict parity with the torch module.
    approx_gelu: tanh-approx GELU (EUP path) instead of exact erf.
    """
    orig_dtype = x.dtype
    B, N, D = x.shape
    H = w1.shape[1]
    M = B * N

    cd = jnp.dtype(compute_dtype) if compute_dtype is not None else jnp.dtype(orig_dtype)
    x = x.astype(cd)
    w1 = w1.astype(cd)
    w2 = w2.astype(cd)
    # Biases stay f32: they are added on the f32 accumulation path.
    b1 = b1.astype(jnp.float32)
    b2 = b2.astype(jnp.float32)

    # Generation-aware tile sizes & VMEM limit.
    vmem_cap = _vmem_capacity_bytes()
    big_vmem = vmem_cap >= 96 * 1024 * 1024       # v5e / v6e (128 MiB) vs v7x (64 MiB)
    if tm is None:
        tm = 1024 if big_vmem else 512
    if th is None:
        th = 1024 if big_vmem else 512
    vmem_limit = int(vmem_cap * 0.85)             # ~108 MiB on v5e/v6e, ~54 MiB on v7x

    # Sublane alignment: bf16 operands need 16-row tiles, f32 needs 8.
    row_align = 16 if cd == jnp.dtype(jnp.bfloat16) else 8

    # Row tiling: ragged-M aware (spread M over the tiles instead of padding up
    # to a full tm), and keep >= 2 row tiles whenever M allows so both v7x
    # TensorCores get work on small-M (decode-style) calls.
    n_tiles = _cdiv(M, tm)
    if n_tiles < 2 and M >= 2 * row_align:
        n_tiles = 2
    tm_eff = max(row_align, _round_up(_cdiv(M, n_tiles), row_align))

    # Hidden-dim slab: 128-lane aligned; never fall back to a full-H block.
    th_eff = max(128, _round_up(min(th, _round_up(H, 128)), 128))

    # VMEM budget (f32 accumulator + double-buffered x/out/W slabs + biases).
    x_bytes = cd.itemsize
    o_bytes = jnp.dtype(orig_dtype).itemsize

    def vmem_usage(tm_, th_):
        return (tm_ * D * 4                              # f32 accumulator
                + 2 * tm_ * D * (x_bytes + o_bytes)      # x + out double buffers
                + 2 * (D * th_ + th_ * D) * x_bytes      # W1 + W2 double buffers
                + 2 * (th_ + D) * 4)                     # biases

    budget = max(vmem_limit - 4 * 1024 * 1024, 8 * 1024 * 1024)
    while vmem_usage(tm_eff, th_eff) > budget and tm_eff > row_align:
        tm_eff = max(row_align, _round_up(tm_eff // 2, row_align))
    while vmem_usage(tm_eff, th_eff) > budget and th_eff > 128:
        th_eff = max(128, _round_up(th_eff // 2, 128))

    M_pad = _round_up(M, tm_eff)
    H_pad = _round_up(H, th_eff)

    x2 = x.reshape(M, D)
    if M_pad != M:
        x2 = jnp.pad(x2, ((0, M_pad - M), (0, 0)))
    if H_pad != H:
        # Exact: padded hidden units give GELU(0 + 0) = 0, times zero W2 rows.
        w1 = jnp.pad(w1, ((0, 0), (0, H_pad - H)))
        b1 = jnp.pad(b1, ((0, H_pad - H),))
        w2 = jnp.pad(w2, ((0, H_pad - H), (0, 0)))

    b1_2 = b1.reshape(1, H_pad)
    b2_2 = b2.reshape(1, D)

    grid_i = M_pad // tm_eff
    grid_j = H_pad // th_eff
    grid = (grid_i, grid_j)

    flops = 4 * M_pad * D * H_pad                 # two (M, D, H) matmuls
    transcendentals = M_pad * H_pad               # one erf/tanh per lin1 element
    weight_bytes = (w1.size * w1.dtype.itemsize + w2.size * w2.dtype.itemsize
                    + b1_2.size * 4 + b2_2.size * 4)
    bytes_accessed = (x2.size * x2.dtype.itemsize
                      + M_pad * D * o_bytes
                      + grid_i * weight_bytes)    # weights re-streamed per row tile

    out = pl.pallas_call(
        _make_mlp_kernel(approx_gelu),
        out_shape=jax.ShapeDtypeStruct((M_pad, D), orig_dtype),
        grid_spec=pltpu.PrefetchScalarGridSpec(
            num_scalar_prefetch=0,
            grid=grid,
            in_specs=[
                pl.BlockSpec((tm_eff, D), lambda i, j: (i, 0)),      # x rows
                pl.BlockSpec((D, th_eff), lambda i, j: (0, j)),      # W1 slab
                pl.BlockSpec((1, th_eff), lambda i, j: (0, j)),      # b1 slab
                pl.BlockSpec((th_eff, D), lambda i, j: (j, 0)),      # W2 slab
                pl.BlockSpec((1, D), lambda i, j: (0, 0)),           # b2
            ],
            out_specs=pl.BlockSpec((tm_eff, D), lambda i, j: (i, 0)),
            scratch_shapes=[pltpu.VMEM((tm_eff, D), jnp.float32)],
        ),
        compiler_params=pltpu.CompilerParams(
            dimension_semantics=("parallel", "arbitrary"),
            vmem_limit_bytes=vmem_limit,
        ),
        cost_estimate=pl.CostEstimate(
            flops=flops,
            transcendentals=transcendentals,
            bytes_accessed=bytes_accessed,
        ),
    )(x2, w1, b1_2, w2, b2_2)

    return out[:M].reshape(B, N, D)


def _reference(x, w1, b1, w2, b2):
    h = jnp.dot(x, w1) + b1
    h = 0.5 * h * (1.0 + jax.lax.erf(h * _INV_SQRT2))
    return jnp.dot(h, w2) + b2


if __name__ == "__main__":
    # Small shapes consistent with MLPBlock3D: (batch, tokens, embedding_dim).
    B, N = 2, 32          # batch, tokens
    D = 256               # embedding_dim
    Hm = 1024             # mlp_dim -> exercises 2 hidden-dim slabs with th=512

    key = jax.random.PRNGKey(0)
    kx, kw1, kb1, kw2, kb2 = jax.random.split(key, 5)

    x = jax.random.normal(kx, (B, N, D), dtype=jnp.float32)

    # PyTorch Linear stores W as (out, in); we store the transpose (in, out)
    # for row-major matmuls.  Init matches nn.Linear defaults.
    bound1 = 1.0 / math.sqrt(D)
    w1 = jax.random.uniform(kw1, (D, Hm), minval=-bound1, maxval=bound1,
                            dtype=jnp.float32)
    b1 = jax.random.uniform(kb1, (Hm,), minval=-bound1, maxval=bound1,
                            dtype=jnp.float32)
    bound2 = 1.0 / math.sqrt(Hm)
    w2 = jax.random.uniform(kw2, (Hm, D), minval=-bound2, maxval=bound2,
                            dtype=jnp.float32)
    b2 = jax.random.uniform(kb2, (D,), minval=-bound2, maxval=bound2,
                            dtype=jnp.float32)

    ref = _reference(x, w1, b1, w2, b2)

    # Strict-parity path: f32 operands, exact erf GELU (torch.nn.GELU default).
    out_f32 = jax.block_until_ready(
        mlp_block_3d(x, w1, b1, w2, b2, th=512, compute_dtype=jnp.float32))
    assert out_f32.shape == (B, N, D)
    assert jnp.allclose(out_f32, ref, atol=1e-4, rtol=1e-4), "f32 mismatch vs reference"

    # Production default: bf16 operands / f32 MXU accumulation.
    out_bf16 = jax.block_until_ready(mlp_block_3d(x, w1, b1, w2, b2, th=512))
    assert out_bf16.shape == (B, N, D)
    assert jnp.allclose(out_bf16.astype(jnp.float32), ref, atol=5e-2, rtol=5e-2), \
        "bf16 mismatch vs reference"

    # EUP-friendly tanh-approx GELU (perf option; not bit-parity with torch erf).
    out_approx = jax.block_until_ready(
        mlp_block_3d(x, w1, b1, w2, b2, th=512, compute_dtype=jnp.float32,
                     approx_gelu=True))
    assert out_approx.shape == (B, N, D)
    assert jnp.allclose(out_approx, ref, atol=2e-2, rtol=2e-2), \
        "approx-GELU mismatch vs reference"

    print("KERNEL_OK")
</pallas_src>

<mosaic_0001>
module attributes {stable_mosaic.version = 11 : i64} {
  func.func @kernel(%arg0: i32, %arg1: i32, %arg2: memref<32x256xf32, #tpu.memory_space<vmem>>, %arg3: memref<256x512xf32, #tpu.memory_space<vmem>>, %arg4: memref<1x512xf32, #tpu.memory_space<vmem>>, %arg5: memref<512x256xf32, #tpu.memory_space<vmem>>, %arg6: memref<1x256xf32, #tpu.memory_space<vmem>>, %arg7: memref<32x256xf32, #tpu.memory_space<vmem>>, %arg8: memref<32x256xf32, #tpu.memory_space<vmem>>) attributes {dimension_semantics = [#tpu.dimension_semantics<parallel>, #tpu.dimension_semantics<arbitrary>], iteration_bounds = array<i64: 2, 2>, scalar_prefetch = 0 : i64, scratch_operands = 1 : i64, tpu.core_type = #tpu.core_type<tc>, window_params = [{transform_indices = @transform_0, window_bounds = array<i64: 32, 256>}, {transform_indices = @transform_1, window_bounds = array<i64: 256, 512>}, {transform_indices = @transform_2, window_bounds = array<i64: 1, 512>}, {transform_indices = @transform_3, window_bounds = array<i64: 512, 256>}, {pipeline_mode = #tpu.pipeline_mode<synchronous>, transform_indices = @transform_4, window_bounds = array<i64: 1, 256>}, {transform_indices = @transform_5, window_bounds = array<i64: 32, 256>}]} {
    %c0 = arith.constant 0 : index
    %c0_0 = arith.constant 0 : index
    %0 = vector.load %arg2[%c0, %c0_0] : memref<32x256xf32, #tpu.memory_space<vmem>>, vector<32x256xf32>
    %c0_1 = arith.constant 0 : index
    %c0_2 = arith.constant 0 : index
    %1 = vector.load %arg3[%c0_1, %c0_2] : memref<256x512xf32, #tpu.memory_space<vmem>>, vector<256x512xf32>
    %cst = arith.constant dense<0.000000e+00> : vector<32x512xf32>
    %2 = tpu.matmul %0, %1, %cst {dimension_numbers = #tpu.dot_dimension_numbers<[1], [0], [0], [1], [0, 0, 1, 1], [], []>} : vector<32x256xf32>, vector<256x512xf32>, vector<32x512xf32> -> vector<32x512xf32>
    %c0_3 = arith.constant 0 : index
    %c0_4 = arith.constant 0 : index
    %3 = vector.load %arg4[%c0_3, %c0_4] : memref<1x512xf32, #tpu.memory_space<vmem>>, vector<1x512xf32>
    %4 = vector.broadcast %3 : vector<1x512xf32> to vector<32x512xf32>
    %5 = arith.addf %2, %4 : vector<32x512xf32>
    %cst_5 = arith.constant 5.000000e-01 : f32
    %6 = vector.broadcast %cst_5 : f32 to vector<32x512xf32>
    %7 = arith.mulf %6, %5 : vector<32x512xf32>
    %cst_6 = arith.constant 0.707106769 : f32
    %8 = vector.broadcast %cst_6 : f32 to vector<32x512xf32>
    %9 = arith.mulf %5, %8 : vector<32x512xf32>
    %10 = math.erf %9 : vector<32x512xf32>
    %cst_7 = arith.constant 1.000000e+00 : f32
    %11 = vector.broadcast %cst_7 : f32 to vector<32x512xf32>
    %12 = arith.addf %11, %10 : vector<32x512xf32>
    %13 = arith.mulf %7, %12 : vector<32x512xf32>
    %c0_8 = arith.constant 0 : index
    %c0_9 = arith.constant 0 : index
    %14 = vector.load %arg5[%c0_8, %c0_9] : memref<512x256xf32, #tpu.memory_space<vmem>>, vector<512x256xf32>
    %cst_10 = arith.constant dense<0.000000e+00> : vector<32x256xf32>
    %15 = tpu.matmul %13, %14, %cst_10 {dimension_numbers = #tpu.dot_dimension_numbers<[1], [0], [0], [1], [0, 0, 1, 1], [], []>} : vector<32x512xf32>, vector<512x256xf32>, vector<32x256xf32> -> vector<32x256xf32>
    %c0_i32 = arith.constant 0 : i32
    %16 = arith.cmpi eq, %arg1, %c0_i32 : i32
    %17 = arith.extui %16 : i1 to i32
    %c0_i32_11 = arith.constant 0 : i32
    %18 = arith.cmpi ne, %17, %c0_i32_11 : i32
    scf.if %18 {
      %c0_15 = arith.constant 0 : index
      %c0_16 = arith.constant 0 : index
      %25 = vector.load %arg6[%c0_15, %c0_16] : memref<1x256xf32, #tpu.memory_space<vmem>>, vector<1x256xf32>
      %26 = vector.broadcast %25 : vector<1x256xf32> to vector<32x256xf32>
      %27 = arith.addf %15, %26 : vector<32x256xf32>
      %c0_17 = arith.constant 0 : index
      %c0_18 = arith.constant 0 : index
      %28 = vector.load %arg8[%c0_17, %c0_18] : memref<32x256xf32, #tpu.memory_space<vmem>>, vector<32x256xf32>
      tpu.vector_store %arg8[%c0_17, %c0_18], %27 {strides = array<i32>} : memref<32x256xf32, #tpu.memory_space<vmem>>, vector<32x256xf32>,
    } else {
    }
    %c0_i32_12 = arith.constant 0 : i32
    %19 = arith.cmpi sgt, %arg1, %c0_i32_12 : i32
    %20 = arith.extui %19 : i1 to i32
    %c0_i32_13 = arith.constant 0 : i32
    %21 = arith.cmpi ne, %20, %c0_i32_13 : i32
    scf.if %21 {
      %c0_15 = arith.constant 0 : index
      %c0_16 = arith.constant 0 : index
      %25 = vector.load %arg8[%c0_15, %c0_16] : memref<32x256xf32, #tpu.memory_space<vmem>>, vector<32x256xf32>
      %26 = arith.addf %25, %15 : vector<32x256xf32>
      %c0_17 = arith.constant 0 : index
      %c0_18 = arith.constant 0 : index
      %27 = vector.load %arg8[%c0_17, %c0_18] : memref<32x256xf32, #tpu.memory_space<vmem>>, vector<32x256xf32>
      tpu.vector_store %arg8[%c0_17, %c0_18], %26 {strides = array<i32>} : memref<32x256xf32, #tpu.memory_space<vmem>>, vector<32x256xf32>,
    } else {
    }
    %c1_i32 = arith.constant 1 : i32
    %22 = arith.cmpi eq, %arg1, %c1_i32 : i32
    %23 = arith.extui %22 : i1 to i32
    %c0_i32_14 = arith.constant 0 : i32
    %24 = arith.cmpi ne, %23, %c0_i32_14 : i32
    scf.if %24 {
      %c0_15 = arith.constant 0 : index
      %c0_16 = arith.constant 0 : index
      %25 = vector.load %arg8[%c0_15, %c0_16] : memref<32x256xf32, #tpu.memory_space<vmem>>, vector<32x256xf32>
      %c0_17 = arith.constant 0 : index
      %c0_18 = arith.constant 0 : index
      %26 = vector.load %arg7[%c0_17, %c0_18] : memref<32x256xf32, #tpu.memory_space<vmem>>, vector<32x256xf32>
      tpu.vector_store %arg7[%c0_17, %c0_18], %25 {strides = array<i32>} : memref<32x256xf32, #tpu.memory_space<vmem>>, vector<32x256xf32>,
    } else {
    }
    return
  }
  func.func @transform_0(%arg0: i32, %arg1: i32) -> (i32, i32) {
    %c0_i32 = arith.constant 0 : i32
    %c0_i32_0 = arith.constant 0 : i32
    return %arg0, %c0_i32 : i32, i32
  }
  func.func @transform_1(%arg0: i32, %arg1: i32) -> (i32, i32) {
    %c0_i32 = arith.constant 0 : i32
    %c0_i32_0 = arith.constant 0 : i32
    return %c0_i32, %arg1 : i32, i32
  }
  func.func @transform_2(%arg0: i32, %arg1: i32) -> (i32, i32) {
    %c0_i32 = arith.constant 0 : i32
    %c0_i32_0 = arith.constant 0 : i32
    return %c0_i32, %arg1 : i32, i32
  }
  func.func @transform_3(%arg0: i32, %arg1: i32) -> (i32, i32) {
    %c0_i32 = arith.constant 0 : i32
    %c0_i32_0 = arith.constant 0 : i32
    return %arg1, %c0_i32 : i32, i32
  }
  func.func @transform_4(%arg0: i32, %arg1: i32) -> (i32, i32) {
    %c0_i32 = arith.constant 0 : i32
    %c0_i32_0 = arith.constant 0 : i32
    %c0_i32_1 = arith.constant 0 : i32
    return %c0_i32, %c0_i32_0 : i32, i32
  }
  func.func @transform_5(%arg0: i32, %arg1: i32) -> (i32, i32) {
    %c0_i32 = arith.constant 0 : i32
    %c0_i32_0 = arith.constant 0 : i32
    return %arg0, %c0_i32 : i32, i32
  }
}

</mosaic_0001>

<bundles_post_ra>
// kernel: tpu_custom_call.1
= control target key start
LH: loop header
LB: loop body
LE: loop exit
PB: predicated region body
PF: predicated region fallthrough
CT: control target
= control target key end

     0   :  { %s2837_s0 = inlined_call_operand.hbm [shape: f32[64,256], index: 0, kind: input, shape index: {}]   ;;  %s2838_s1 = inlined_call_operand.hbm [shape: f32[256,1024], index: 1, kind: input, shape index: {}]   ;;  %s2839_s2 = inlined_call_operand.hbm [shape: f32[1,1024], index: 2, kind: input, shape index: {}]   ;;  %s2840_s3 = inlined_call_operand.hbm [shape: f32[1024,256], index: 3, kind: input, shape index: {}]   ;;  %s2841_s4 = inlined_call_operand.vmem [shape: f32[1,256], index: 4, kind: input, shape index: {}]   ;;  %s2842_s5 = inlined_call_operand.hbm [shape: f32[64,256], index: 5, kind: output, shape index: {}]  }
   0x1   :  { %2859 = sst [smem:[#allocation25_spill]] %s2837_s0 }
   0x2   :  { %2860 = sst [smem:[#allocation26_spill]] %s2838_s1 }
   0x3   :  { %2861 = sst [smem:[#allocation27_spill]] %s2841_s4 }
   0x4   :  { %2862 = sst [smem:[#allocation28_spill]] %s2842_s5 }
   0x5   :  { %10 = vsyncpa [#allocation4], 0 }
   0x6   :  { %12 = vsyncpa [#allocation4 + $0x1], 0 }
   0x7   :  { %13 = vsyncpa [#allocation7], 0 }
   0x8   :  { %15 = vsyncpa [#allocation7 + $0x1], 0 }
   0x9   :  { %16 = vsyncpa [#allocation10], 0 }
   0xa   :  { %18 = vsyncpa [#allocation10 + $0x1], 0 }
   0xb   :  { %19 = vsyncpa [#allocation5], 0 }
   0xc   :  { %21 = vsyncpa [#allocation5 + $0x1], 0  ;;  %s2099_s18 = smov 0   ;;  %s2101_s19 = smov 0  }
   0xd   :  { %s2103_s20 = smov 0   ;;  %s2105_s21 = smov 0  }
   0xe   :  { %s2107_s22 = smov 0   ;;  %s2109_s23 = smov 0  }
   0xf   :  { %s2111_s24 = smov 0   ;;  %s2113_s25 = smov 0  }
  0x10   :  { %s2115_s26 = smov 0   ;;  %s2117_s27 = smov 0  }
  0x11   :  { %s2119_s28 = smov 0  }
  0x12 LB: > { %2863 = sst [smem:[#allocation16_spill]] %s2023_s20  ;;  %p2845_p0 = scmp.eq.s32.totalorder %s2055_s28, 0  ;;  %s2055_s28 = sphi %s2119_s28, %s27_s28   ;;  %s2051_s27 = sphi %s2117_s27, %s2906_s27   ;;  %s2047_s26 = sphi %s2115_s26, %s2912_s26   ;;  %s2043_s25 = sphi %s2113_s25, %s2904_s25   ;;  %s2039_s24 = sphi %s2111_s24, %s2911_s24   ;;  %s2035_s23 = sphi %s2109_s23, %s2903_s23   ;;  %s2031_s22 = sphi %s2107_s22, %s2910_s22   ;;  %s2027_s21 = sphi %s2105_s21, %s2909_s21   ;;  %s2023_s20 = sphi %s2103_s20, %s2901_s20   ;;  %s2019_s19 = sphi %s2101_s19, %s2908_s19   ;;  %s2015_s18 = sphi %s2099_s18, %s2907_s18  }
  0x13   : > { %2864 = sst [smem:[#allocation17_spill]] %s2035_s23  ;;  %p79_p1 = scmp.ne.s32.totalorder %s2023_s20, %s2019_s19 }
  0x14   : > { %2865 = sst [smem:[#allocation18_spill]] %s2043_s25  ;;  %p2844_p3 = scmp.lt.s32.totalorder %s2055_s28, 4 }
  0x15   : > { %2866 = sst [smem:[#allocation19_spill]] %s2051_s27  ;;  %p81_p4 = por %p79_p1, %p2845_p0 }
  0x16   : > { %s233_s30 = sand.u32 1, %s2055_s28   ;;  %s2165_s6 = sand.u32 1, %s2023_s20  }
  0x17   : > { %s2843_s7 = sshll.u32 %s2165_s6, 10  ;;  %s1379_s8 = sshll.u32 %s2047_s26, 9 }
  0x18   : > { %s2867_s1 = sld [smem:[#allocation26_spill]]  ;;  %s237_s12 = scalar_lea.vmem [#allocation6], %s2843_s7 }
  0x19   : > { %s244_s13 = sshll.u32 %s237_s12, 4  ;;  %p2178_p5 = pnand %p2844_p3, %p81_p4  ;;  %s2182_s13 = int_to_ptr.vmem [resolvable:$true] %s244_s13 }
  0x1a   : > { %s2185_s15 = scalar_lea.sflag [#allocation7], %s233_s30 }
  0x1b   : > { %s2868_s14 = scalar_select %p2178_p5, 1, 0 }
  0x1c   : > { %p2191_p8 = pneg %p2178_p5 }
  0x1e   : > { %s2172_s11 = scalar_lea.hbm %s2867_s1, %s1379_s8  ;;  %s1810_s10 = scalar_lea.hbm %s2867_s1, 32768 }
  0x1f   : > { %s1805_s16 = scalar_lea.hbm %s2172_s11, 16384  ;;  %p1811_p11 = scmp.lt.u32.totalorder %s2172_s11, %s2867_s1 }
  0x20   : > { %p1806_p7 = scmp.ne.s32.totalorder %s2172_s11, %s1805_s16  ;;  %p1812_p12 = scmp.lt.u32.totalorder %s1810_s10, %s1805_s16 }
  0x21   : > { %p1814_p1 = scmp.lt.u32.totalorder %s1805_s16, %s2172_s11 }
  0x22   : > { %p1808_p9 = pnand %p2191_p8, %p1806_p7  ;;  %p1813_p13 = por %p1812_p12, %p1811_p11 }
  0x24   : > { %p1809_p10 = pneg %p1808_p9  ;;  %p1815_p4 = por %p1814_p1, %p1813_p13 }
  0x26   : > { %p1816_p3 = pnand %p1815_p4, %p1809_p10 }
  0x28   : > { %1819 = shalt.err (!%p1816_p3)
}
  0x29   : > { %s1820_s30 = scalar_lea.vmem %s2182_s13, 16384  ;;  %s2057_s8 = smov [#allocation6]  }
  0x2a   : > { %p1821_p7 = scmp.ne.s32.totalorder %s2182_s13, %s1820_s30  ;;  %s1825_s9 = sshll.u32 %s2057_s8, 4  ;;  %s1826_s9 = int_to_ptr.vmem [resolvable:$false] %s1825_s9 }
  0x2b   : > { %s1827_s7 = scalar_lea.vmem %s1826_s9, 32768  ;;  %p1828_p0 = scmp.lt.s32.totalorder %s2182_s13, %s1826_s9 }
  0x2c   : > { %p1823_p9 = pnand %p1821_p7, %p2191_p8  ;;  %p1829_p6 = scmp.lt.s32.totalorder %s1827_s7, %s1820_s30 }
  0x2e   : > { %p1824_p2 = pneg %p1823_p9  ;;  %p1830_p11 = por %p1829_p6, %p1828_p0 }
  0x30   : > { %p1831_p12 = pnand %p1830_p11, %p1824_p2 }
  0x32   : > { %1834 = shalt.err (!%p1831_p12)
}
  0x33   : > { %s2058_s16 = smov 1024   ;;  %s2059_s10 = smov 512  }
  0x34   : > { %s2060_s12 = smov 32   ;;  %p293_p0 = scmp.lt.s32.totalorder %s2055_s28, 5 }
  0x35   : > { %1665 = dma.hbm_to_vmem [thread:$0]  (!%p2178_p5), %s2172_s11, 16384, %s2182_s13, %s2185_s15, %s2058_s16, %s2059_s10, %s2060_s12  }
  0x36   : > { %p2870_p2 = scmp.ge.s32.totalorder %s2055_s28, 1  ;;  %s2223_s8 = sadd.s32 4294967295, %s2055_s28  }
  0x37   : > { %s1345_s9 = sadd.s32 4294967294, %s2055_s28   ;;  %s36_s7 = sadd.s32 1, %s2047_s26 }
  0x38   : > { %p2218_p3 = pnand %p2870_p2, %p293_p0  ;;  %s39_s29 = sadd.s32 1, %s2051_s27 }
  0x39   : > { %p37_p6 = scmp.ge.s32.totalorder %s36_s7, 2  ;;  %s46_s11 = sadd.s32 1, %s2035_s23 }
  0x3a   : > { %s2871_s30 = scalar_select %p2218_p3, 1, 0 }
  0x3b   : > { %p53_p10 = scmp.ne.s32.totalorder %s2035_s23, %s2031_s22  ;;  %p2847_p13 = scmp.ne.s32.totalorder %s2031_s22, %s2027_s21 }
  0x3c   : > { %s2914_s7 = smov (%p37_p6, %s36_s7), 0  ;;  %s2916_s29 = smov (!%p37_p6, %s39_s29), %s2051_s27 }
  0x3d   : > { %2872 = sst [smem:[#allocation20_spill]] %s2914_s7  ;;  %p2873_p1 = scmp.eq.s32.totalorder %s2055_s28, 0 }
  0x3e   : > { %p60_p7 = scmp.eq.s32.totalorder %s2223_s8, 0  ;;  %p41_p9 = scmp.ge.s32.totalorder %s2916_s29, 2 }
  0x3f   : > { %p2241_p4 = por %p2873_p1, %p53_p10  ;;  %s69_s16 = ssub.s32 %s2047_s26, %s2914_s7 }
  0x40   : > { %p2251_p11 = por %p60_p7, %p2847_p13  ;;  %p70_p12 = scmp.eq.s32.totalorder %s69_s16, 0 }
  0x41   : > { %s2918_s29 = smov (%p41_p9, %s2916_s29), 0  ;;  %s2877_s12 = sadd.s32 1, %s2023_s20 }
  0x42   : > { %s2875_s10 = scalar_select %p2251_p11, 1, 0 }
  0x43   : > { %2876 = sst [smem:[#allocation21_spill]] %s2918_s29  ;;  %s43_s5 = ssub.s32 %s2051_s27, %s2918_s29 }
  0x44   : > { %s2260_s1 = scalar_select %p70_p12, %s2023_s20, %s2877_s12  }
  0x45   : > { %p2879_p0 = scmp.ne.s32.totalorder %s2019_s19, %s2015_s18  ;;  %p44_p6 = scmp.eq.s32.totalorder %s43_s5, 0 }
  0x46   : > { %2878 = sst [smem:[#allocation22_spill]] %s2260_s1  ;;  %p182_p1 = scmp.eq.s32.totalorder %s2223_s8, 3 }
  0x47   : > { %p2267_p2 = por %p2879_p0, %p60_p7  ;;  %p188_p13 = scmp.eq.s32.totalorder %s1345_s9, 3 }
  0x48   : > { %s211_s7 = sand.u32 1, %s2035_s23   ;;  %p2279_p9 = por %p182_p1, %p53_p10 }
  0x49   : > { %s2880_s25 = scalar_select %p2267_p2, 1, 0 }
  0x4a   : > { %s2274_s16 = scalar_select %p44_p6, %s2035_s23, %s46_s11  }
  0x4b   : > { %s2882_s4 = scalar_select %p2279_p9, 1, 0 }
  0x4c   : > { %2881 = sst [smem:[#allocation23_spill]] %s2274_s16  ;;  %p2883_p12 = scmp.ne.s32.totalorder %s2031_s22, %s2027_s21 }
  0x4d   : > { %s1348_s18 = sshll.u32 %s211_s7, 6  ;;  %s1378_s29 = sshll.u32 %s2051_s27, 10 }
  0x4e   : > { %p2286_p11 = por %p188_p13, %p2883_p12  ;;  %s2886_s0 = sld [smem:[#allocation25_spill]] }
  0x4f   : > { %s215_s9 = scalar_lea.vmem [#allocation3], %s1348_s18  ;;  %p2887_p10 = scmp.lt.s32.totalorder %s2055_s28, 4 }
  0x50   : > { %s2884_s12 = scalar_select %p2286_p11, 1, 0 }
  0x51   : > { %s223_s11 = sshll.u32 %s215_s9, 4  ;;  %p2302_p13 = pnand %p2887_p10, %p2241_p4  ;;  %s2296_s11 = int_to_ptr.vmem [resolvable:$true] %s223_s11 }
  0x52   : > { %2885 = sst [smem:[#allocation24_spill]] %s2884_s12  ;;  %s1355_s27 = sshll.u32 %s2165_s6, 2 }
  0x53   : > { %s2307_s1 = scalar_lea.sflag [#allocation4], %s211_s7  ;;  %p1837_p0 = pneg %p2302_p13 }
  0x54   : > { %s2294_s5 = scalar_lea.hbm %s2886_s0, %s1378_s29  ;;  %s1840_s18 = scalar_lea.hbm %s2886_s0, 2048 }
  0x55   : > { %s1835_s20 = scalar_lea.hbm %s2294_s5, 1024  ;;  %p1841_p4 = scmp.lt.u32.totalorder %s2294_s5, %s2886_s0 }
  0x56   : > { %p1836_p7 = scmp.ne.s32.totalorder %s2294_s5, %s1835_s20  ;;  %p1842_p12 = scmp.lt.u32.totalorder %s1840_s18, %s1835_s20 }
  0x57   : > { %p1844_p11 = scmp.lt.u32.totalorder %s1835_s20, %s2294_s5 }
  0x58   : > { %p1838_p6 = pnand %p1837_p0, %p1836_p7  ;;  %p1843_p10 = por %p1842_p12, %p1841_p4 }
  0x5a   : > { %p1839_p1 = pneg %p1838_p6  ;;  %p1845_p9 = por %p1844_p11, %p1843_p10 }
  0x5c   : > { %p1846_p2 = pnand %p1845_p9, %p1839_p1 }
  0x5e   : > { %1849 = shalt.err (!%p1846_p2)
}
  0x5f   : > { %s1850_s7 = scalar_lea.vmem %s2296_s11, 1024  ;;  %s2061_s29 = smov [#allocation3]  }
  0x60   : > { %p1851_p7 = scmp.ne.s32.totalorder %s2296_s11, %s1850_s7  ;;  %s1855_s13 = sshll.u32 %s2061_s29, 4  ;;  %s1856_s13 = int_to_ptr.vmem [resolvable:$false] %s1855_s13 }
  0x61   : > { %s1857_s23 = scalar_lea.vmem %s1856_s13, 2048  ;;  %p1858_p5 = scmp.lt.s32.totalorder %s2296_s11, %s1856_s13 }
  0x62   : > { %p1853_p6 = pnand %p1851_p7, %p1837_p0  ;;  %p1859_p4 = scmp.lt.s32.totalorder %s1857_s23, %s1850_s7 }
  0x64   : > { %p1854_p3 = pneg %p1853_p6  ;;  %p1860_p12 = por %p1859_p4, %p1858_p5 }
  0x66   : > { %p1861_p11 = pnand %p1860_p12, %p1854_p3 }
  0x68   : > { %1864 = shalt.err (!%p1861_p11)
}
  0x69   : > { %s2062_s20 = smov 256   ;;  %s2063_s18 = smov 16  }
  0x6a   : > { %1662 = dma.hbm_to_vmem [thread:$0]  (!%p2302_p13), %s2294_s5, 1024, %s2296_s11, %s2307_s1, %s2062_s20, %s2062_s20, %s2063_s18  }
  0x6b   : > { %s1380_s9 = sshll.u32 %s2047_s26, 6  ;;  %s258_s23 = scalar_lea.vmem [#allocation8], %s1355_s27 }
  0x6c   : > { %s2342_s13 = scalar_lea.hbm %s2839_s2, %s1380_s9  ;;  %s266_s0 = sshll.u32 %s258_s23, 4  ;;  %s267_s0 = int_to_ptr.vmem [resolvable:$true] %s266_s0 }
  0x6d   : > { %s1865_s12 = scalar_lea.hbm %s2342_s13, 64  ;;  %s1870_s11 = scalar_lea.hbm %s2839_s2, 128 }
  0x6e   : > { %p1866_p5 = scmp.ne.s32.totalorder %s2342_s13, %s1865_s12  ;;  %p1871_p9 = scmp.lt.u32.totalorder %s2342_s13, %s2839_s2 }
  0x6f   : > { %p1872_p13 = scmp.lt.u32.totalorder %s1870_s11, %s1865_s12  ;;  %p1874_p1 = scmp.lt.u32.totalorder %s1865_s12, %s2342_s13 }
  0x70   : > { %p1868_p3 = pnand %p1866_p5, %p2191_p8 }
  0x71   : > { %p1873_p0 = por %p1872_p13, %p1871_p9 }
  0x72   : > { %p1869_p2 = pneg %p1868_p3 }
  0x73   : > { %p1875_p10 = por %p1874_p1, %p1873_p0 }
  0x75   : > { %p1876_p7 = pnand %p1875_p10, %p1869_p2 }
  0x77   : > { %1879 = shalt.err (!%p1876_p7)
}
  0x78   : > { %s1880_s27 = scalar_lea.vmem %s267_s0, 64  ;;  %s2064_s29 = smov [#allocation8]  }
  0x79   : > { %p1881_p6 = scmp.ne.s32.totalorder %s267_s0, %s1880_s27  ;;  %s1885_s7 = sshll.u32 %s2064_s29, 4  ;;  %s1886_s7 = int_to_ptr.vmem [resolvable:$false] %s1885_s7 }
  0x7a   : > { %s1887_s23 = scalar_lea.vmem %s1886_s7, 128  ;;  %p1888_p11 = scmp.lt.s32.totalorder %s267_s0, %s1886_s7 }
  0x7b   : > { %p1883_p4 = pnand %p1881_p6, %p2191_p8  ;;  %p1889_p5 = scmp.lt.s32.totalorder %s1887_s23, %s1880_s27 }
  0x7d   : > { %p1884_p12 = pneg %p1883_p4  ;;  %p1890_p3 = por %p1889_p5, %p1888_p11 }
  0x7f   : > { %p1891_p9 = pnand %p1890_p3, %p1884_p12 }
  0x81   : > { %1894 = shalt.err (!%p1891_p9)
}
  0x82   : > { %p2889_p13 = scmp.ne.s32.totalorder %s2868_s14, 0  ;;  %s1382_s12 = sshll.u32 %s2047_s26, 14 }
  0x83   : > { %s2368_s11 = scalar_lea.hbm %s2840_s3, %s1382_s12  ;;  %s2890_s1 = sshll.u32 %s2165_s6, 10 }
  0x84   : > { %1668 = dma.hbm_to_vmem [thread:$0]  (!%p2889_p13), %s2342_s13, 64, %s267_s0, %s2185_s15  }
  0x85   : > { %s277_s9 = scalar_lea.vmem [#allocation9], %s2890_s1  ;;  %s274_s29 = scalar_lea.sflag [#allocation10], %s2165_s6 }
  0x86   : > { %s285_s27 = sshll.u32 %s277_s9, 4  ;;  %s1895_s7 = scalar_lea.hbm %s2368_s11, 16384  ;;  %s2372_s27 = int_to_ptr.vmem [resolvable:$true] %s285_s27 }
  0x87   : > { %p1896_p2 = scmp.ne.s32.totalorder %s2368_s11, %s1895_s7  ;;  %s1900_s13 = scalar_lea.hbm %s2840_s3, 32768 }
  0x88   : > { %p1901_p10 = scmp.lt.u32.totalorder %s2368_s11, %s2840_s3  ;;  %p1902_p7 = scmp.lt.u32.totalorder %s1900_s13, %s1895_s7 }
  0x89   : > { %p1898_p0 = pnand %p1896_p2, %p2191_p8  ;;  %p1904_p4 = scmp.lt.u32.totalorder %s1895_s7, %s2368_s11 }
  0x8a   : > { %p1903_p6 = por %p1902_p7, %p1901_p10 }
  0x8b   : > { %p1899_p1 = pneg %p1898_p0 }
  0x8c   : > { %p1905_p12 = por %p1904_p4, %p1903_p6 }
  0x8e   : > { %p1906_p11 = pnand %p1905_p12, %p1899_p1 }
  0x90   : > { %1909 = shalt.err (!%p1906_p11)
}
  0x91   : > { %s1910_s16 = scalar_lea.vmem %s2372_s27, 16384  ;;  %s2065_s5 = smov [#allocation9]  }
  0x92   : > { %p1911_p5 = scmp.ne.s32.totalorder %s2372_s27, %s1910_s16  ;;  %s1915_s1 = sshll.u32 %s2065_s5, 4  ;;  %s1916_s1 = int_to_ptr.vmem [resolvable:$false] %s1915_s1 }
  0x93   : > { %s1917_s9 = scalar_lea.vmem %s1916_s1, 32768  ;;  %p1918_p2 = scmp.lt.s32.totalorder %s2372_s27, %s1916_s1 }
  0x94   : > { %p1913_p3 = pnand %p1911_p5, %p2191_p8  ;;  %p1919_p0 = scmp.lt.s32.totalorder %s1917_s9, %s1910_s16 }
  0x96   : > { %p1914_p9 = pneg %p1913_p3  ;;  %p1920_p10 = por %p1919_p0, %p1918_p2 }
  0x98   : > { %p1921_p7 = pnand %p1920_p10, %p1914_p9 }
  0x9a   : > { %1924 = shalt.err (!%p1921_p7)
}
  0x9b   : > { %1671 = dma.hbm_to_vmem [thread:$0]  (!%p2889_p13), %s2368_s11, 16384, %s2372_s27, %s274_s29, %s2062_s20, %s2062_s20, %s2063_s18  }
  0x9c   : > { %p2891_p8 = scmp.ne.s32.totalorder %s2871_s30, 0 }
  0x9d   : > { %s2404_s17 = sand.u32 (!%p2891_p8), 1, %s2031_s22   ;;  %p2892_p1 = scmp.ne.s32.totalorder (!%p2891_p8), %s2875_s10, 0 }
  0x9e   : > { %297 = sbr.rel (%p2891_p8) target bundleno = 814 (0x32e), region = 40  ;;  %s1363_s7 = sshll.u32 (!%p2891_p8), %s2404_s17, 6 }
  0x9f   : > { %s300_s14 = scalar_lea.sflag (!%p2891_p8), [#allocation4], %s2404_s17  ;;  %s2410_s0 = scalar_lea.vmem (!%p2891_p8), [#allocation3], %s1363_s7 }
  0xa5   : > { %1998 = dma.done.wait (%p2892_p1), %s300_s14, 1024  }
  0xa6   : > { %2000 = vsyncadd (%p2892_p1), %s300_s14, 4294966272  ;;  %s308_s6 = sand.u32 1, %s2223_s8   ;;  %s310_s30 = sand.u32 1, %s2019_s19  }
  0xa7   : > { %s1364_s20 = sshll.u32 %s310_s30, 10  ;;  %s309_s18 = scalar_lea.sflag [#allocation7], %s308_s6 }
  0xa8   : > { %s2418_s11 = scalar_lea.vmem [#allocation6], %s1364_s20  ;;  %p2893_p13 = scmp.ne.s32.totalorder %s2880_s25, 0 }
  0xaa   : > { %2002 = dma.done.wait (%p2893_p13), %s309_s18, 16448  }
  0xab   : > { %2004 = vsyncadd (%p2893_p13), %s309_s18, 4294950848  ;;  %s1365_s27 = sshll.u32 %s310_s30, 2  ;;  %s327_s10 = scalar_lea.sflag [#allocation10], %s310_s30 }
  0xac   : > { %s2424_s29 = scalar_lea.vmem [#allocation8], %s1365_s27  ;;  %s2426_s15 = scalar_lea.vmem [#allocation9], %s1364_s20 }
  0xad   : > { %2006 = dma.done.wait (%p2893_p13), %s327_s10, 16384  }
  0xae   : > { %2008 = vsyncadd (%p2893_p13), %s327_s10, 4294950912  ;;  %v386_v0 = vld [vmem:[%s2418_s11 + $0x8] sm:$0xff]  ;;  %v385_v2 = vld [vmem:[%s2418_s11] sm:$0xff]  ;;  %s2747_s25 = scalar_lea.vmem [#allocation11], %s1363_s7  ;;  %p1368_p6 = scmp.ne.s32.totalorder %s2039_s24, 0 }
  0xaf   : > { %v390_v1 = vld [vmem:[%s2418_s11 + $0x28] sm:$0xff]  ;;  %v389_v4 = vld [vmem:[%s2418_s11 + $0x20] sm:$0xff]  ;;  %s2894_s23 = sld [smem:[#allocation27_spill]] (!%p1368_p6) }
  0xb0   : > { %v1385_v3 = vpack.c.bf16 %v390_v1, %v386_v0  ;;  %v394_v5 = vld [vmem:[%s2418_s11 + $0x48] sm:$0xff]  ;;  %v1387_v7 = vpack.c.bf16 %v389_v4, %v385_v2  ;;  %v393_v9 = vld [vmem:[%s2418_s11 + $0x40] sm:$0xff] }
  0xb1   : > { %v398_v6 = vld [vmem:[%s2418_s11 + $0x68] sm:$0xff]  ;;  %v397_v10 = vld [vmem:[%s2418_s11 + $0x60] sm:$0xff] }
  0xb2   : > { %v1389_v8 = vpack.c.bf16 %v398_v6, %v394_v5  ;;  %v402_v11 = vld [vmem:[%s2418_s11 + $0x88] sm:$0xff]  ;;  %1386 = vmatprep.subr.bf16.mxu1 %v1385_v3  ;;  %v1391_v13 = vpack.c.bf16 %v397_v10, %v393_v9  ;;  %v401_v15 = vld [vmem:[%s2418_s11 + $0x80] sm:$0xff] }
  0xb3   : > { %v406_v12 = vld [vmem:[%s2418_s11 + $0xa8] sm:$0xff]  ;;  %1388 = vmatpush1.bf16.msra.mxu1 %v1387_v7  ;;  %v405_v16 = vld [vmem:[%s2418_s11 + $0xa0] sm:$0xff] }
  0xb4   : > { %1390 = vmatprep.subr.bf16.mxu1 %v1389_v8  ;;  %v1393_v14 = vpack.c.bf16 %v406_v12, %v402_v11  ;;  %v410_v17 = vld [vmem:[%s2418_s11 + $0xc8] sm:$0xff]  ;;  %v1395_v19 = vpack.c.bf16 %v405_v16, %v401_v15  ;;  %v409_v21 = vld [vmem:[%s2418_s11 + $0xc0] sm:$0xff]  ;;  %v794_v16 = vld [vmem:[%s2426_s15 + $0x8] sm:$0xff] }
  0xb5   : > { %v414_v18 = vld [vmem:[%s2418_s11 + $0xe8] sm:$0xff]  ;;  %v413_v22 = vld [vmem:[%s2418_s11 + $0xe0] sm:$0xff] }
  0xb6   : > { %v1397_v20 = vpack.c.bf16 %v414_v18, %v410_v17  ;;  %v418_v23 = vld [vmem:[%s2418_s11 + $0x108] sm:$0xff]  ;;  %v1399_v25 = vpack.c.bf16 %v413_v22, %v409_v21  ;;  %v417_v27 = vld [vmem:[%s2418_s11 + $0x100] sm:$0xff]  ;;  %v798_v21 = vld [vmem:[%s2426_s15 + $0x28] sm:$0xff] }
  0xb7   : > { %1392 = vmatpush1.bf16.msra.mxu1 %v1391_v13  ;;  %v422_v24 = vld [vmem:[%s2418_s11 + $0x128] sm:$0xff]  ;;  %v421_v28 = vld [vmem:[%s2418_s11 + $0x120] sm:$0xff] }
  0xb8   : > { %1394 = vmatprep.subr.bf16.mxu1 %v1393_v14  ;;  %v1401_v26 = vpack.c.bf16 %v422_v24, %v418_v23  ;;  %v426_v29 = vld [vmem:[%s2418_s11 + $0x148] sm:$0xff]  ;;  %v1403_v31 = vpack.c.bf16 %v421_v28, %v417_v27  ;;  %v425_v33 = vld [vmem:[%s2418_s11 + $0x140] sm:$0xff]  ;;  %v802_v28 = vld [vmem:[%s2426_s15 + $0x48] sm:$0xff] }
  0xb9   : > { %v430_v30 = vld [vmem:[%s2418_s11 + $0x168] sm:$0xff]  ;;  %v429_v34 = vld [vmem:[%s2418_s11 + $0x160] sm:$0xff] }
  0xba   : > { %v1405_v32 = vpack.c.bf16 %v430_v30, %v426_v29  ;;  %v434_v35 = vld [vmem:[%s2418_s11 + $0x188] sm:$0xff]  ;;  %v1407_v37 = vpack.c.bf16 %v429_v34, %v425_v33  ;;  %v433_v39 = vld [vmem:[%s2418_s11 + $0x180] sm:$0xff] }
  0xbb   : > { %1396 = vmatpush1.bf16.msra.mxu1 %v1395_v19  ;;  %v438_v36 = vld [vmem:[%s2418_s11 + $0x1a8] sm:$0xff]  ;;  %v437_v40 = vld [vmem:[%s2418_s11 + $0x1a0] sm:$0xff] }
  0xbc   : > { %1398 = vmatprep.subr.bf16.mxu1 %v1397_v20  ;;  %v1409_v38 = vpack.c.bf16 %v438_v36, %v434_v35  ;;  %v2461_v41 = vld [vmem:[%s2410_s0 + $0x8] sm:$0xff]  ;;  %v1411_v44 = vpack.c.bf16 %v437_v40, %v433_v39  ;;  %v441_v46 = vld [vmem:[%s2418_s11 + $0x1c0] sm:$0xff]  ;;  %v795_v20 = vld [vmem:[%s2426_s15 + $0x10] sm:$0xff] }
  0xbd   : > { %v442_v42 = vld [vmem:[%s2418_s11 + $0x1c8] sm:$0xff]  ;;  %599 = vmatprep.mubr.f32.mxu1 %v2461_v41  ;;  %v445_v47 = vld [vmem:[%s2418_s11 + $0x1e0] sm:$0xff]  ;;  %v806_v39 = vld [vmem:[%s2426_s15 + $0x68] sm:$0xff] }
  0xbe   : > { %v446_v43 = vld [vmem:[%s2418_s11 + $0x1e8] sm:$0xff]  ;;  %v1415_v50 = vpack.c.bf16 %v445_v47, %v441_v46  ;;  %v449_v52 = vld [vmem:[%s2418_s11 + $0x200] sm:$0xff] }
  0xbf   : > { %1400 = vmatpush1.bf16.msra.mxu1 %v1399_v25  ;;  %v1413_v45 = vpack.c.bf16 %v446_v43, %v442_v42  ;;  %v450_v48 = vld [vmem:[%s2418_s11 + $0x208] sm:$0xff]  ;;  %v453_v53 = vld [vmem:[%s2418_s11 + $0x220] sm:$0xff]  ;;  %v799_v25 = vld [vmem:[%s2426_s15 + $0x30] sm:$0xff] }
  0xc0   : > { %1402 = vmatprep.subr.bf16.mxu1 %v1401_v26  ;;  %v454_v49 = vld [vmem:[%s2418_s11 + $0x228] sm:$0xff]  ;;  %v1419_v56 = vpack.c.bf16 %v453_v53, %v449_v52  ;;  %v457_v58 = vld [vmem:[%s2418_s11 + $0x240] sm:$0xff]  ;;  %v810_v52 = vld [vmem:[%s2426_s15 + $0x88] sm:$0xff] }
  0xc1   : > { %v1417_v51 = vpack.c.bf16 %v454_v49, %v450_v48  ;;  %v458_v54 = vld [vmem:[%s2418_s11 + $0x248] sm:$0xff]  ;;  %v461_v59 = vld [vmem:[%s2418_s11 + $0x260] sm:$0xff] }
  0xc2   : > { %v462_v55 = vld [vmem:[%s2418_s11 + $0x268] sm:$0xff]  ;;  %v1423_v62 = vpack.c.bf16 %v461_v59, %v457_v58  ;;  %v465_v0 = vld [vmem:[%s2418_s11 + $0x280] sm:$0xff]  ;;  %v388_v58 = vld [vmem:[%s2418_s11 + $0x18] sm:$0xff] }
  0xc3   : > { %1404 = vmatpush1.bf16.msra.mxu1 %v1403_v31  ;;  %v1421_v57 = vpack.c.bf16 %v462_v55, %v458_v54  ;;  %v466_v60 = vld [vmem:[%s2418_s11 + $0x288] sm:$0xff]  ;;  %v469_v1 = vld [vmem:[%s2418_s11 + $0x2a0] sm:$0xff] }
  0xc4   : > { %1406 = vmatprep.subr.bf16.mxu1 %v1405_v32  ;;  %v470_v61 = vld [vmem:[%s2418_s11 + $0x2a8] sm:$0xff]  ;;  %v1427_v4 = vpack.c.bf16 %v469_v1, %v465_v0  ;;  %v473_v6 = vld [vmem:[%s2418_s11 + $0x2c0] sm:$0xff]  ;;  %v814_v0 = vld [vmem:[%s2426_s15 + $0xa8] sm:$0xff] }
  0xc5   : > { %v1425_v63 = vpack.c.bf16 %v470_v61, %v466_v60  ;;  %v474_v2 = vld [vmem:[%s2418_s11 + $0x2c8] sm:$0xff]  ;;  %v477_v7 = vld [vmem:[%s2418_s11 + $0x2e0] sm:$0xff]  ;;  %v392_v60 = vld [vmem:[%s2418_s11 + $0x38] sm:$0xff] }
  0xc6   : > { %v478_v3 = vld [vmem:[%s2418_s11 + $0x2e8] sm:$0xff]  ;;  %v1431_v10 = vpack.c.bf16 %v477_v7, %v473_v6  ;;  %v481_v11 = vld [vmem:[%s2418_s11 + $0x300] sm:$0xff]  ;;  %v396_v6 = vld [vmem:[%s2418_s11 + $0x58] sm:$0xff] }
  0xc7   : > { %1408 = vmatpush1.bf16.msra.mxu1 %v1407_v37  ;;  %v1429_v5 = vpack.c.bf16 %v478_v3, %v474_v2  ;;  %v482_v8 = vld [vmem:[%s2418_s11 + $0x308] sm:$0xff]  ;;  %v485_v12 = vld [vmem:[%s2418_s11 + $0x320] sm:$0xff]  ;;  %v1449_v3 = vpack.c.bf16 %v392_v60, %v388_v58  ;;  %v2581_v58 = vld [vmem:[%s2410_s0 + $0x30] sm:$0xff] }
  0xc8   : > { %1410 = vmatprep.subr.bf16.mxu1 %v1409_v38  ;;  %v486_v9 = vld [vmem:[%s2418_s11 + $0x328] sm:$0xff]  ;;  %v796_v17 = vld [vmem:[%s2426_s15 + $0x18] sm:$0xff]  ;;  %v1435_v26 = vpack.c.bf16 %v485_v12, %v481_v11  ;;  %v803_v38 = vld [vmem:[%s2426_s15 + $0x50] sm:$0xff] }
  0xc9   : > { %v490_v13 = vld [vmem:[%s2418_s11 + $0x348] sm:$0xff]  ;;  %v1433_v14 = vpack.c.bf16 %v486_v9, %v482_v8  ;;  %v1513_v18 = vpack.c.bf16 %v796_v17, %v794_v16  ;;  %v800_v23 = vld [vmem:[%s2426_s15 + $0x38] sm:$0xff]  ;;  %v400_v8 = vld [vmem:[%s2418_s11 + $0x78] sm:$0xff] }
  0xca   : > { %v494_v15 = vld [vmem:[%s2418_s11 + $0x368] sm:$0xff]  ;;  %v1517_v27 = vpack.c.bf16 %v800_v23, %v798_v21  ;;  %v804_v29 = vld [vmem:[%s2426_s15 + $0x58] sm:$0xff]  ;;  %v815_v11 = vld [vmem:[%s2426_s15 + $0xb0] sm:$0xff]  ;;  %v1453_v17 = vpack.c.bf16 %v400_v8, %v396_v6 }
  0xcb   : > { %1412 = vmatpush1.bf16.msra.mxu1 %v1411_v44  ;;  %v793_v19 = vld [vmem:[%s2426_s15] sm:$0xff]  ;;  %1514 = vmatprep.subr.bf16.mxu0 %v1513_v18  ;;  %v1437_v30 = vpack.c.bf16 %v494_v15, %v490_v13  ;;  %v489_v31 = vld [vmem:[%s2418_s11 + $0x340] sm:$0xff]  ;;  %v1521_v36 = vpack.c.bf16 %v804_v29, %v802_v28  ;;  %v818_v12 = vld [vmem:[%s2426_s15 + $0xc8] sm:$0xff] }
  0xcc   : > { %1414 = vmatprep.subr.bf16.mxu1 %v1413_v45  ;;  %v1515_v22 = vpack.c.bf16 %v795_v20, %v793_v19  ;;  %v797_v24 = vld [vmem:[%s2426_s15 + $0x20] sm:$0xff]  ;;  %v493_v32 = vld [vmem:[%s2418_s11 + $0x360] sm:$0xff]  ;;  %v395_v16 = vld [vmem:[%s2418_s11 + $0x50] sm:$0xff] }
  0xcd   : > { %v498_v33 = vld [vmem:[%s2418_s11 + $0x388] sm:$0xff]  ;;  %v1519_v34 = vpack.c.bf16 %v799_v25, %v797_v24  ;;  %v808_v40 = vld [vmem:[%s2426_s15 + $0x78] sm:$0xff]  ;;  %v1439_v42 = vpack.c.bf16 %v493_v32, %v489_v31  ;;  %v399_v18 = vld [vmem:[%s2418_s11 + $0x70] sm:$0xff] }
  0xce   : > { %1516 = vmatpush1.bf16.msra.mxu0 %v1515_v22  ;;  %v502_v35 = vld [vmem:[%s2418_s11 + $0x3a8] sm:$0xff]  ;;  %v497_v44 = vld [vmem:[%s2418_s11 + $0x380] sm:$0xff]  ;;  %v1525_v49 = vpack.c.bf16 %v808_v40, %v806_v39  ;;  %v404_v19 = vld [vmem:[%s2418_s11 + $0x98] sm:$0xff]  ;;  %v1455_v28 = vpack.c.bf16 %v399_v18, %v395_v16 }
  0xcf   : > { %1416 = vmatpush1.bf16.msra.mxu1 %v1415_v50  ;;  %1518 = vmatprep.subr.bf16.mxu0 %v1517_v27  ;;  %v801_v37 = vld [vmem:[%s2426_s15 + $0x40] sm:$0xff]  ;;  %v1441_v43 = vpack.c.bf16 %v502_v35, %v498_v33  ;;  %v501_v45 = vld [vmem:[%s2418_s11 + $0x3a0] sm:$0xff]  ;;  %v2539_v20 = vld [vmem:[%s2410_s0 + $0x18] sm:$0xff] }
  0xd0   : > { %1418 = vmatprep.subr.bf16.mxu1 %v1417_v51  ;;  %v506_v46 = vld [vmem:[%s2418_s11 + $0x3c8] sm:$0xff]  ;;  %v1523_v47 = vpack.c.bf16 %v803_v38, %v801_v37  ;;  %v807_v51 = vld [vmem:[%s2426_s15 + $0x70] sm:$0xff]  ;;  %v812_v53 = vld [vmem:[%s2426_s15 + $0x98] sm:$0xff]  ;;  %v1443_v54 = vpack.c.bf16 %v501_v45, %v497_v44 }
  0xd1   : > { %v510_v48 = vld [vmem:[%s2418_s11 + $0x3e8] sm:$0xff]  ;;  %v1529_v61 = vpack.c.bf16 %v812_v53, %v810_v52  ;;  %v816_v1 = vld [vmem:[%s2426_s15 + $0xb8] sm:$0xff]  ;;  %v408_v22 = vld [vmem:[%s2418_s11 + $0xb8] sm:$0xff] }
  0xd2   : > { %1520 = vmatpush1.bf16.msra.mxu0 %v1519_v34  ;;  %v805_v50 = vld [vmem:[%s2426_s15 + $0x60] sm:$0xff]  ;;  %v1445_v55 = vpack.c.bf16 %v510_v48, %v506_v46  ;;  %v1533_v9 = vpack.c.bf16 %v816_v1, %v814_v0  ;;  %v820_v13 = vld [vmem:[%s2426_s15 + $0xd8] sm:$0xff]  ;;  %v819_v25 = vld [vmem:[%s2426_s15 + $0xd0] sm:$0xff]  ;;  %v1457_v31 = vpack.c.bf16 %v408_v22, %v404_v19 }
  0xd3   : > { %1420 = vmatpush1.bf16.msra.mxu1 %v1419_v56  ;;  %1522 = vmatprep.subr.bf16.mxu0 %v1521_v36  ;;  %v505_v56 = vld [vmem:[%s2418_s11 + $0x3c0] sm:$0xff]  ;;  %v1527_v59 = vpack.c.bf16 %v807_v51, %v805_v50  ;;  %v1537_v23 = vpack.c.bf16 %v820_v13, %v818_v12  ;;  %v817_v24 = vld [vmem:[%s2426_s15 + $0xc0] sm:$0xff]  ;;  %v403_v29 = vld [vmem:[%s2418_s11 + $0x90] sm:$0xff] }
  0xd4   : > { %1422 = vmatprep.subr.bf16.mxu1 %v1421_v57  ;;  %v509_v57 = vld [vmem:[%s2418_s11 + $0x3e0] sm:$0xff]  ;;  %v407_v32 = vld [vmem:[%s2418_s11 + $0xb0] sm:$0xff]  ;;  %v412_v33 = vld [vmem:[%s2418_s11 + $0xd8] sm:$0xff]  ;;  %v1539_v35 = vpack.c.bf16 %v819_v25, %v817_v24 }
  0xd5   : > { %v1447_v2 = vpack.c.bf16 %v509_v57, %v505_v56  ;;  %v824_v27 = vld [vmem:[%s2426_s15 + $0xf8] sm:$0xff]  ;;  %v2555_v34 = vld [vmem:[%s2410_s0 + $0x28] sm:$0xff]  ;;  %v416_v36 = vld [vmem:[%s2418_s11 + $0xf8] sm:$0xff] }
  0xd6   : > { %1524 = vmatpush1.bf16.msra.mxu0 %v1523_v47  ;;  %v821_v38 = vld [vmem:[%s2426_s15 + $0xe0] sm:$0xff]  ;;  %v823_v39 = vld [vmem:[%s2426_s15 + $0xf0] sm:$0xff]  ;;  %v826_v40 = vld [vmem:[%s2426_s15 + $0x108] sm:$0xff]  ;;  %v1461_v46 = vpack.c.bf16 %v416_v36, %v412_v33 }
  0xd7   : > { %1424 = vmatpush1.bf16.msra.mxu1 %v1423_v62  ;;  %1526 = vmatprep.subr.bf16.mxu0 %v1525_v49  ;;  %v809_v62 = vld [vmem:[%s2426_s15 + $0x80] sm:$0xff]  ;;  %v411_v44 = vld [vmem:[%s2418_s11 + $0xd0] sm:$0xff]  ;;  %v2566_v45 = vld [vmem:[%s2410_s0 + $0x20] sm:$0xff]  ;;  %v1543_v50 = vpack.c.bf16 %v823_v39, %v821_v38 }
  0xd8   : > { %1426 = vmatprep.subr.bf16.mxu1 %v1425_v63  ;;  %v811_v63 = vld [vmem:[%s2426_s15 + $0x90] sm:$0xff]  ;;  %v415_v47 = vld [vmem:[%s2418_s11 + $0xf0] sm:$0xff]  ;;  %v825_v53 = vld [vmem:[%s2426_s15 + $0x100] sm:$0xff] }
  0xd9   : > { %v1531_v7 = vpack.c.bf16 %v811_v63, %v809_v62  ;;  %v420_v48 = vld [vmem:[%s2418_s11 + $0x118] sm:$0xff]  ;;  %v832_v56 = vld [vmem:[%s2426_s15 + $0x138] sm:$0xff]  ;;  %v1463_v57 = vpack.c.bf16 %v415_v47, %v411_v44  ;;  %v419_v60 = vld [vmem:[%s2418_s11 + $0x110] sm:$0xff] }
  0xda   : > { %1528 = vmatpush1.bf16.msra.mxu0 %v1527_v59  ;;  %v2571_v49 = vld [vmem:[%s2410_s0 + $0x38] sm:$0xff]  ;;  %v427_v8 = vld [vmem:[%s2418_s11 + $0x150] sm:$0xff] }
  0xdb   : > { %1428 = vmatpush1.bf16.msra.mxu1 %v1427_v4  ;;  %v387_v4 = vld [vmem:[%s2418_s11 + $0x10] sm:$0xff]  ;;  %1530 = vmatprep.subr.bf16.mxu0 %v1529_v61  ;;  %v424_v51 = vld [vmem:[%s2418_s11 + $0x138] sm:$0xff] }
  0xdc   : > { %1430 = vmatprep.subr.bf16.mxu1 %v1429_v5  ;;  %v391_v5 = vld [vmem:[%s2418_s11 + $0x30] sm:$0xff]  ;;  %v1465_v59 = vpack.c.bf16 %v424_v51, %v420_v48  ;;  %v428_v62 = vld [vmem:[%s2418_s11 + $0x158] sm:$0xff] }
  0xdd   : > { %v1451_v15 = vpack.c.bf16 %v391_v5, %v387_v4  ;;  %v423_v61 = vld [vmem:[%s2418_s11 + $0x130] sm:$0xff]  ;;  %v432_v0 = vld [vmem:[%s2418_s11 + $0x178] sm:$0xff]  ;;  %v836_v5 = vld [vmem:[%s2426_s15 + $0x158] sm:$0xff] }
  0xde   : > { %1532 = vmatpush1.bf16.msra.mxu0 %v1531_v7  ;;  %v834_v4 = vld [vmem:[%s2426_s15 + $0x148] sm:$0xff]  ;;  %v1467_v6 = vpack.c.bf16 %v423_v61, %v419_v60  ;;  %v1469_v7 = vpack.c.bf16 %v432_v0, %v428_v62  ;;  %v440_v12 = vld [vmem:[%s2418_s11 + $0x1b8] sm:$0xff] }
  0xdf   : > { %1432 = vmatpush1.bf16.msra.mxu1 %v1431_v10  ;;  %v813_v10 = vld [vmem:[%s2426_s15 + $0xa0] sm:$0xff]  ;;  %1534 = vmatprep.subr.bf16.mxu0 %v1533_v9  ;;  %v431_v9 = vld [vmem:[%s2418_s11 + $0x170] sm:$0xff]  ;;  %v1553_v13 = vpack.c.bf16 %v836_v5, %v834_v4  ;;  %v835_v16 = vld [vmem:[%s2426_s15 + $0x150] sm:$0xff] }
  0xe0   : > { %1434 = vmatprep.subr.bf16.mxu1 %v1433_v14  ;;  %v2533_v14 = vld [vmem:[%s2410_s0] sm:$0xff]  ;;  %v1535_v21 = vpack.c.bf16 %v815_v11, %v813_v10  ;;  %v436_v10 = vld [vmem:[%s2418_s11 + $0x198] sm:$0xff]  ;;  %v435_v18 = vld [vmem:[%s2418_s11 + $0x190] sm:$0xff] }
  0xe1   : > { %v439_v19 = vld [vmem:[%s2418_s11 + $0x1b0] sm:$0xff]  ;;  %v444_v22 = vld [vmem:[%s2418_s11 + $0x1d8] sm:$0xff] }
  0xe2   : > { %1536 = vmatpush1.bf16.msra.mxu0 %v1535_v21  ;;  %v1475_v24 = vpack.c.bf16 %v439_v19, %v435_v18  ;;  %v451_v33 = vld [vmem:[%s2418_s11 + $0x210] sm:$0xff]  ;;  %v460_v36 = vld [vmem:[%s2418_s11 + $0x258] sm:$0xff] }
  0xe3   : > { %1436 = vmatpush1.bf16.msra.mxu1 %v1435_v26  ;;  %v822_v26 = vld [vmem:[%s2426_s15 + $0xe8] sm:$0xff]  ;;  %1538 = vmatprep.subr.bf16.mxu0 %v1537_v23  ;;  %v448_v23 = vld [vmem:[%s2418_s11 + $0x1f8] sm:$0xff] }
  0xe4   : > { %1438 = vmatprep.subr.bf16.mxu1 %v1437_v30  ;;  %v2550_v30 = vld [vmem:[%s2410_s0 + $0x10] sm:$0xff]  ;;  %v1541_v37 = vpack.c.bf16 %v824_v27, %v822_v26  ;;  %v1477_v25 = vpack.c.bf16 %v448_v23, %v444_v22  ;;  %v472_v44 = vld [vmem:[%s2418_s11 + $0x2b8] sm:$0xff]  ;;  %v837_v22 = vld [vmem:[%s2426_s15 + $0x160] sm:$0xff] }
  0xe5   : > { %v443_v26 = vld [vmem:[%s2418_s11 + $0x1d0] sm:$0xff]  ;;  %v476_v51 = vld [vmem:[%s2418_s11 + $0x2d8] sm:$0xff]  ;;  %v844_v23 = vld [vmem:[%s2426_s15 + $0x198] sm:$0xff] }
  0xe6   : > { %1540 = vmatpush1.bf16.msra.mxu0 %v1539_v35  ;;  %v447_v27 = vld [vmem:[%s2418_s11 + $0x1f0] sm:$0xff]  ;;  %v492_v0 = vld [vmem:[%s2418_s11 + $0x358] sm:$0xff] }
  0xe7   : > { %1440 = vmatpush1.bf16.msra.mxu1 %v1439_v42  ;;  %v828_v42 = vld [vmem:[%s2426_s15 + $0x118] sm:$0xff]  ;;  %1542 = vmatprep.subr.bf16.mxu0 %v1541_v37  ;;  %v455_v35 = vld [vmem:[%s2418_s11 + $0x230] sm:$0xff]  ;;  %v464_v37 = vld [vmem:[%s2418_s11 + $0x278] sm:$0xff] }
  0xe8   : > { %1442 = vmatprep.subr.bf16.mxu1 %v1441_v43  ;;  %v1459_v43 = vpack.c.bf16 %v407_v32, %v403_v29  ;;  %v1545_v52 = vpack.c.bf16 %v828_v42, %v826_v40  ;;  %v456_v29 = vld [vmem:[%s2418_s11 + $0x238] sm:$0xff]  ;;  %v1483_v38 = vpack.c.bf16 %v455_v35, %v451_v33  ;;  %v1485_v39 = vpack.c.bf16 %v464_v37, %v460_v36  ;;  %v459_v40 = vld [vmem:[%s2418_s11 + $0x250] sm:$0xff]  ;;  %v852_v33 = vld [vmem:[%s2426_s15 + $0x1d8] sm:$0xff] }
  0xe9   : > { %v463_v42 = vld [vmem:[%s2418_s11 + $0x270] sm:$0xff]  ;;  %v849_v36 = vld [vmem:[%s2426_s15 + $0x1c0] sm:$0xff]  ;;  %v851_v37 = vld [vmem:[%s2426_s15 + $0x1d0] sm:$0xff] }
  0xea   : > { %1544 = vmatpush1.bf16.msra.mxu0 %v1543_v50  ;;  %v467_v48 = vld [vmem:[%s2418_s11 + $0x290] sm:$0xff] }
  0xeb   : > { %1444 = vmatpush1.bf16.msra.mxu1 %v1443_v54  ;;  %v827_v54 = vld [vmem:[%s2426_s15 + $0x110] sm:$0xff]  ;;  %1546 = vmatprep.subr.bf16.mxu0 %v1545_v52  ;;  %v471_v50 = vld [vmem:[%s2418_s11 + $0x2b0] sm:$0xff] }
  0xec   : > { %1446 = vmatprep.subr.bf16.mxu1 %v1445_v55  ;;  %v830_v55 = vld [vmem:[%s2426_s15 + $0x128] sm:$0xff]  ;;  %v1547_v63 = vpack.c.bf16 %v827_v54, %v825_v53  ;;  %v480_v52 = vld [vmem:[%s2418_s11 + $0x2f8] sm:$0xff]  ;;  %v1491_v53 = vpack.c.bf16 %v471_v50, %v467_v48  ;;  %v860_v48 = vld [vmem:[%s2426_s15 + $0x218] sm:$0xff] }
  0xed   : > { %v1549_v1 = vpack.c.bf16 %v832_v56, %v830_v55  ;;  %v1493_v54 = vpack.c.bf16 %v480_v52, %v476_v51  ;;  %v475_v55 = vld [vmem:[%s2418_s11 + $0x2d0] sm:$0xff]  ;;  %v515_v51 = vlaneseq }
  0xee   : > { %1548 = vmatpush1.bf16.msra.mxu0 %v1547_v63  ;;  %v479_v56 = vld [vmem:[%s2418_s11 + $0x2f0] sm:$0xff] }
  0xef   : > { %1448 = vmatpush1.bf16.msra.mxu1 %v1447_v2  ;;  %v829_v2 = vld [vmem:[%s2426_s15 + $0x120] sm:$0xff]  ;;  %1550 = vmatprep.subr.bf16.mxu0 %v1549_v1  ;;  %v1495_v60 = vpack.c.bf16 %v479_v56, %v475_v55  ;;  %v483_v62 = vld [vmem:[%s2418_s11 + $0x310] sm:$0xff]  ;;  %v496_v1 = vld [vmem:[%s2418_s11 + $0x378] sm:$0xff]  ;;  %v2666_v52 = vshrl.u32 %v515_v51, 7 }
  0xf0   : > { %1450 = vmatprep.subr.bf16.mxu1 %v1449_v3  ;;  %v831_v3 = vld [vmem:[%s2426_s15 + $0x130] sm:$0xff]  ;;  %v487_v63 = vld [vmem:[%s2418_s11 + $0x330] sm:$0xff] }
  0xf1   : > { %v1551_v11 = vpack.c.bf16 %v831_v3, %v829_v2  ;;  %v1499_v2 = vpack.c.bf16 %v487_v63, %v483_v62  ;;  %v1501_v3 = vpack.c.bf16 %v496_v1, %v492_v0  ;;  %v491_v4 = vld [vmem:[%s2418_s11 + $0x350] sm:$0xff]  ;;  %v521_v55 = vsub.s32 1, %v2666_v52  ;;  %v867_v51 = vld [vmem:[%s2426_s15 + $0x250] sm:$0xff] }
  0xf2   : > { %600 = vmatmul.mubr.f32.vlgmr.msra.gmra.mrb[0].mxu1 %v2533_v14  ;;  %v495_v5 = vld [vmem:[%s2418_s11 + $0x370] sm:$0xff] }
  0xf3   : > { %1452 = vmatpush1.bf16.msra.mxu1 %v1451_v15  ;;  %605 = vmatprep.mubr.f32.mxu1 %v2539_v20  ;;  %v833_v15 = vld [vmem:[%s2426_s15 + $0x140] sm:$0xff]  ;;  %v838_v19 = vld [vmem:[%s2426_s15 + $0x168] sm:$0xff] }
  0xf4   : > { %1454 = vmatprep.subr.bf16.mxu1 %v1453_v17  ;;  %v1473_v17 = vpack.c.bf16 %v440_v12, %v436_v10  ;;  %1552 = vmatpush1.bf16.msra.mxu0 %v1551_v11  ;;  %v1555_v21 = vpack.c.bf16 %v835_v16, %v833_v15  ;;  %v499_v10 = vld [vmem:[%s2418_s11 + $0x390] sm:$0xff]  ;;  %v508_v12 = vld [vmem:[%s2418_s11 + $0x3d8] sm:$0xff] }
  0xf5   : > { %1554 = vmatprep.subr.bf16.mxu0 %v1553_v13  ;;  %v503_v11 = vld [vmem:[%s2418_s11 + $0x3b0] sm:$0xff]  ;;  %v512_v13 = vld [vmem:[%s2418_s11 + $0x3f8] sm:$0xff] }
  0xf6   : > { %606 = vmatmul.mubr.f32.gmra.mrb[2].mxu1 %v2550_v30  ;;  %v1507_v15 = vpack.c.bf16 %v503_v11, %v499_v10  ;;  %v1509_v16 = vpack.c.bf16 %v512_v13, %v508_v12 }
  0xf7   : > { %1456 = vmatpush1.bf16.msra.mxu1 %v1455_v28  ;;  %611 = vmatprep.mubr.f32.mxu1 %v2555_v34  ;;  %v452_v28 = vld [vmem:[%s2418_s11 + $0x218] sm:$0xff] }
  0xf8   : > { %1458 = vmatprep.subr.bf16.mxu1 %v1457_v31  ;;  %1556 = vmatpush1.bf16.msra.mxu0 %v1555_v21  ;;  %v1479_v31 = vpack.c.bf16 %v447_v27, %v443_v26  ;;  %v1481_v32 = vpack.c.bf16 %v456_v29, %v452_v28  ;;  %v840_v21 = vld [vmem:[%s2426_s15 + $0x178] sm:$0xff]  ;;  %v845_v28 = vld [vmem:[%s2426_s15 + $0x1a0] sm:$0xff]  ;;  %v847_v29 = vld [vmem:[%s2426_s15 + $0x1b0] sm:$0xff] }
  0xf9   : > { %v848_v26 = vld [vmem:[%s2426_s15 + $0x1b8] sm:$0xff] }
  0xfa   : > { %612 = vmatmul.mubr.f32.gmra.mrb[4].mxu1 %v2566_v45 }
  0xfb   : > { %1460 = vmatpush1.bf16.msra.mxu1 %v1459_v43  ;;  %617 = vmatprep.mubr.f32.mxu1 %v2571_v49  ;;  %v468_v43 = vld [vmem:[%s2418_s11 + $0x298] sm:$0xff] }
  0xfc   : > { %1462 = vmatprep.subr.bf16.mxu1 %v1461_v46  ;;  %v1487_v46 = vpack.c.bf16 %v463_v42, %v459_v40  ;;  %v1489_v47 = vpack.c.bf16 %v472_v44, %v468_v43  ;;  %v856_v40 = vld [vmem:[%s2426_s15 + $0x1f8] sm:$0xff]  ;;  %v853_v43 = vld [vmem:[%s2426_s15 + $0x1e0] sm:$0xff]  ;;  %v855_v44 = vld [vmem:[%s2426_s15 + $0x1f0] sm:$0xff] }
  0xfe   : > { %618 = vmatmul.mubr.f32.gmra.mrb[6].mxu1 %v2581_v58 }
  0xff   : > { %1464 = vmatpush1.bf16.msra.mxu1 %v1463_v57  ;;  %688 = vmatprep.mubr.f32.mxu1 %v2461_v41  ;;  %v1471_v41 = vpack.c.bf16 %v431_v9, %v427_v8  ;;  %v484_v57 = vld [vmem:[%s2418_s11 + $0x318] sm:$0xff]  ;;  %v1503_v8 = vpack.c.bf16 %v495_v5, %v491_v4 }
 0x100   : > { %1466 = vmatprep.subr.bf16.mxu1 %v1465_v59  ;;  %v488_v59 = vld [vmem:[%s2418_s11 + $0x338] sm:$0xff] }
 0x101   : > { %v1497_v61 = vpack.c.bf16 %v488_v59, %v484_v57 }
 0x103   : > { %1468 = vmatpush1.bf16.msra.mxu1 %v1467_v6  ;;  %v500_v6 = vld [vmem:[%s2418_s11 + $0x398] sm:$0xff] }
 0x104   : > { %1470 = vmatprep.subr.bf16.mxu1 %v1469_v7  ;;  %v504_v7 = vld [vmem:[%s2418_s11 + $0x3b8] sm:$0xff] }
 0x105   : > { %v1505_v9 = vpack.c.bf16 %v504_v7, %v500_v6 }
 0x107   : > { %1472 = vmatpush1.bf16.msra.mxu1 %v1471_v41  ;;  %v507_v41 = vld [vmem:[%s2418_s11 + $0x3d0] sm:$0xff] }
 0x108   : > { %1474 = vmatprep.subr.bf16.mxu1 %v1473_v17  ;;  %v511_v17 = vld [vmem:[%s2418_s11 + $0x3f0] sm:$0xff] }
 0x109   : > { %v1511_v18 = vpack.c.bf16 %v511_v17, %v507_v41 }
 0x10b   : > { %1476 = vmatpush1.bf16.msra.mxu1 %v1475_v24 }
 0x10c   : > { %1478 = vmatprep.subr.bf16.mxu1 %v1477_v25  ;;  %v846_v25 = vld [vmem:[%s2426_s15 + $0x1a8] sm:$0xff] }
 0x10d   : > { %v1565_v27 = vpack.c.bf16 %v848_v26, %v846_v25 }
 0x10f   : > { %1480 = vmatpush1.bf16.msra.mxu1 %v1479_v31  ;;  %v1567_v31 = vpack.c.bf16 %v847_v29, %v845_v28 }
 0x110   : > { %1482 = vmatprep.subr.bf16.mxu1 %v1481_v32  ;;  %v850_v32 = vld [vmem:[%s2426_s15 + $0x1c8] sm:$0xff] }
 0x111   : > { %v1569_v35 = vpack.c.bf16 %v852_v33, %v850_v32  ;;  %v861_v32 = vld [vmem:[%s2426_s15 + $0x220] sm:$0xff]  ;;  %v863_v33 = vld [vmem:[%s2426_s15 + $0x230] sm:$0xff] }
 0x113   : > { %1484 = vmatpush1.bf16.msra.mxu1 %v1483_v38  ;;  %v1571_v38 = vpack.c.bf16 %v851_v37, %v849_v36  ;;  %v866_v36 = vld [vmem:[%s2426_s15 + $0x248] sm:$0xff]  ;;  %v868_v37 = vld [vmem:[%s2426_s15 + $0x258] sm:$0xff] }
 0x114   : > { %1486 = vmatprep.subr.bf16.mxu1 %v1485_v39  ;;  %v854_v39 = vld [vmem:[%s2426_s15 + $0x1e8] sm:$0xff] }
 0x115   : > { %v1573_v42 = vpack.c.bf16 %v856_v40, %v854_v39 }
 0x117   : > { %1488 = vmatpush1.bf16.msra.mxu1 %v1487_v46  ;;  %v1575_v46 = vpack.c.bf16 %v855_v44, %v853_v43  ;;  %v1583_v43 = vpack.c.bf16 %v863_v33, %v861_v32 }
 0x118   : > { %1490 = vmatprep.subr.bf16.mxu1 %v1489_v47  ;;  %v858_v47 = vld [vmem:[%s2426_s15 + $0x208] sm:$0xff] }
 0x119   : > { %v1577_v50 = vpack.c.bf16 %v860_v48, %v858_v47  ;;  %v1585_v48 = vpack.c.bf16 %v868_v37, %v866_v36  ;;  %v891_v36 = vld [vmem:[%s2426_s15 + $0x310] sm:$0xff]  ;;  %v894_v37 = vld [vmem:[%s2426_s15 + $0x328] sm:$0xff] }
 0x11b   : > { %1492 = vmatpush1.bf16.msra.mxu1 %v1491_v53  ;;  %v517_v53 = vsub.s32 0, %v2666_v52 }
 0x11c   : > { %1494 = vmatprep.subr.bf16.mxu1 %v1493_v54  ;;  %v2670_v54 = vld [vmem:[%s2424_s29] sm:$0xf] }
 0x11d   : > { %v518_v56 = vrot.slane %v2670_v54, %v517_v53  ;;  %v522_v57 = vrot.slane %v2670_v54, %v521_v55 }
 0x11f   : > { %1496 = vmatpush1.bf16.msra.mxu1 %v1495_v60 }
 0x120   : > { %1498 = vmatprep.subr.bf16.mxu1 %v1497_v61 }
 0x123   : > { %1500 = vmatpush1.bf16.msra.mxu1 %v1499_v2 }
 0x124   : > { %1502 = vmatprep.subr.bf16.mxu1 %v1501_v3 }
 0x127   : > { %1504 = vmatpush1.bf16.msra.mxu1 %v1503_v8 }
 0x128   : > { %1506 = vmatprep.subr.bf16.mxu1 %v1505_v9 }
 0x12b   : > { %1508 = vmatpush1.bf16.msra.mxu1 %v1507_v15 }
 0x12c   : > { %1510 = vmatprep.subr.bf16.mxu1 %v1509_v16 }
 0x12f   : > { %1512 = vmatpush1.bf16.msra.mxu1 %v1511_v18 }
 0x132   : > { %689 = vmatmul.mubr.f32.vlgmr.msra.gmra.mrb[8].mxu1 %v2533_v14  ;;  %v1557_v14 = vpack.c.bf16 %v840_v21, %v838_v19 }
 0x133   : > { %694 = vmatprep.mubr.f32.mxu1 %v2539_v20  ;;  %v839_v20 = vld [vmem:[%s2426_s15 + $0x170] sm:$0xff] }
 0x134   : > { %1558 = vmatprep.subr.bf16.mxu0 %v1557_v14  ;;  %v857_v14 = vld [vmem:[%s2426_s15 + $0x200] sm:$0xff] }
 0x136   : > { %695 = vmatmul.mubr.f32.gmra.mrb[10].mxu1 %v2550_v30  ;;  %v1559_v30 = vpack.c.bf16 %v839_v20, %v837_v22  ;;  %v859_v22 = vld [vmem:[%s2426_s15 + $0x210] sm:$0xff] }
 0x137   : > { %700 = vmatprep.mubr.f32.mxu1 %v2555_v34  ;;  %v842_v34 = vld [vmem:[%s2426_s15 + $0x188] sm:$0xff]  ;;  %v1579_v26 = vpack.c.bf16 %v859_v22, %v857_v14  ;;  %v877_v14 = vld [vmem:[%s2426_s15 + $0x2a0] sm:$0xff]  ;;  %v879_v22 = vld [vmem:[%s2426_s15 + $0x2b0] sm:$0xff] }
 0x138   : > { %1560 = vmatpush1.bf16.msra.mxu0 %v1559_v30 }
 0x13a   : > { %701 = vmatmul.mubr.f32.gmra.mrb[12].mxu1 %v2566_v45  ;;  %v1561_v45 = vpack.c.bf16 %v844_v23, %v842_v34  ;;  %v862_v23 = vld [vmem:[%s2426_s15 + $0x228] sm:$0xff] }
 0x13b   : > { %706 = vmatprep.mubr.f32.mxu1 %v2571_v49  ;;  %v841_v49 = vld [vmem:[%s2426_s15 + $0x180] sm:$0xff] }
 0x13c   : > { %1562 = vmatprep.subr.bf16.mxu0 %v1561_v45  ;;  %v864_v45 = vld [vmem:[%s2426_s15 + $0x238] sm:$0xff] }
 0x13e   : > { %707 = vmatmul.mubr.f32.gmra.mrb[14].mxu1 %v2581_v58  ;;  %v843_v58 = vld [vmem:[%s2426_s15 + $0x190] sm:$0xff] }
 0x13f   : > { %v1563_v24 = vpack.c.bf16 %v843_v58, %v841_v49 }
 0x141   : > { %1564 = vmatpush1.bf16.msra.mxu0 %v1563_v24 }
 0x142   : > { %1566 = vmatprep.subr.bf16.mxu0 %v1565_v27 }
 0x145   : > { %1568 = vmatpush1.bf16.msra.mxu0 %v1567_v31  ;;  %v1581_v31 = vpack.c.bf16 %v864_v45, %v862_v23  ;;  %v881_v45 = vld [vmem:[%s2426_s15 + $0x2c0] sm:$0xff] }
 0x146   : > { %1570 = vmatprep.subr.bf16.mxu0 %v1569_v35 }
 0x149   : > { %1572 = vmatpush1.bf16.msra.mxu0 %v1571_v38 }
 0x14a   : > { %1574 = vmatprep.subr.bf16.mxu0 %v1573_v42 }
 0x14d   : > { %1576 = vmatpush1.bf16.msra.mxu0 %v1575_v46 }
 0x14e   : > { %1578 = vmatprep.subr.bf16.mxu0 %v1577_v50  ;;  %v865_v50 = vld [vmem:[%s2426_s15 + $0x240] sm:$0xff] }
 0x1c5   : > { %v601_v59 = vpop.f32.mrb[0].mxu1 }
 0x1c6   : > { %v602_v60 = vadd.f32 %v601_v59, %v518_v56  ;;  %v603_v61 = vpop.f32.mrb[1].mxu1  ;;  %v872_v59 = vld [vmem:[%s2426_s15 + $0x278] sm:$0xff] }
 0x1c7   : > { %v604_v62 = vadd.f32 %v603_v61, %v522_v57 }
 0x1c8   : > { %v729_v63 = vmul.f32 0.70710677, %v602_v60  ;;  %v713_v49 = vmul.f32 0.5, %v602_v60 }
 0x1c9   : > { %v730_v0 = vmul.f32 0.70710677, %v604_v62  ;;  %v607_v1 = vpop.f32.mrb[2].mxu1  ;;  %v714_v30 = vmul.f32 0.5, %v604_v62 }
 0x1ca   : > { %1773 = verf.f32 %v729_v63  ;;  %v608_v2 = vadd.f32 %v607_v1, %v518_v56  ;;  %v609_v3 = vpop.f32.mrb[3].mxu1 }
 0x1cb   : > { %1775 = verf.f32 %v730_v0  ;;  %v610_v4 = vadd.f32 %v609_v3, %v522_v57  ;;  %v1587_v0 = vpack.c.bf16 %v867_v51, %v865_v50  ;;  %v897_v50 = vld [vmem:[%s2426_s15 + $0x340] sm:$0xff]  ;;  %v899_v51 = vld [vmem:[%s2426_s15 + $0x350] sm:$0xff] }
 0x1cc   : > { %v733_v5 = vmul.f32 0.70710677, %v608_v2  ;;  %v717_v58 = vmul.f32 0.5, %v608_v2 }
 0x1cd   : > { %v734_v6 = vmul.f32 0.70710677, %v610_v4  ;;  %v613_v7 = vpop.f32.mrb[4].mxu1  ;;  %v718_v27 = vmul.f32 0.5, %v610_v4 }
 0x1ce   : > { %1777 = verf.f32 %v733_v5  ;;  %v614_v8 = vadd.f32 %v613_v7, %v518_v56  ;;  %v615_v9 = vpop.f32.mrb[5].mxu1  ;;  %v869_v5 = vld [vmem:[%s2426_s15 + $0x260] sm:$0xff] }
 0x1cf   : > { %1779 = verf.f32 %v734_v6  ;;  %v616_v10 = vadd.f32 %v615_v9, %v522_v57  ;;  %v871_v6 = vld [vmem:[%s2426_s15 + $0x270] sm:$0xff]  ;;  %v876_v9 = vld [vmem:[%s2426_s15 + $0x298] sm:$0xff] }
 0x1d0   : > { %v737_v11 = vmul.f32 0.70710677, %v614_v8  ;;  %v721_v39 = vmul.f32 0.5, %v614_v8  ;;  %v874_v8 = vld [vmem:[%s2426_s15 + $0x288] sm:$0xff] }
 0x1d1   : > { %v738_v12 = vmul.f32 0.70710677, %v616_v10  ;;  %v619_v13 = vpop.f32.mrb[6].mxu1  ;;  %v722_v44 = vmul.f32 0.5, %v616_v10 }
 0x1d2   : > { %1781 = verf.f32 %v737_v11  ;;  %v620_v15 = vadd.f32 %v619_v13, %v518_v56  ;;  %v621_v16 = vpop.f32.mrb[7].mxu1 }
 0x1d3   : > { %1783 = verf.f32 %v738_v12  ;;  %v622_v41 = vadd.f32 %v621_v16, %v522_v57  ;;  %v870_v57 = vld [vmem:[%s2426_s15 + $0x268] sm:$0xff]  ;;  %v1591_v12 = vpack.c.bf16 %v871_v6, %v869_v5  ;;  %v873_v16 = vld [vmem:[%s2426_s15 + $0x280] sm:$0xff] }
 0x1d4   : > { %v1774_v17 = vpop.eup %1773  ;;  %v741_v18 = vmul.f32 0.70710677, %v620_v15  ;;  %v725_v61 = vmul.f32 0.5, %v620_v15  ;;  %v1589_v4 = vpack.c.bf16 %v872_v59, %v870_v57  ;;  %v1593_v15 = vpack.c.bf16 %v876_v9, %v874_v8  ;;  %v902_v57 = vld [vmem:[%s2426_s15 + $0x368] sm:$0xff]  ;;  %v904_v59 = vld [vmem:[%s2426_s15 + $0x378] sm:$0xff]  ;;  %v905_v8 = vld [vmem:[%s2426_s15 + $0x380] sm:$0xff] }
 0x1d5   : > { %v1776_v19 = vpop.eup %1775  ;;  %v761_v21 = vadd.f32 1.0, %v1774_v17  ;;  %v742_v20 = vmul.f32 0.70710677, %v622_v41  ;;  %v726_v1 = vmul.f32 0.5, %v622_v41  ;;  %v875_v41 = vld [vmem:[%s2426_s15 + $0x290] sm:$0xff]  ;;  %v878_v17 = vld [vmem:[%s2426_s15 + $0x2a8] sm:$0xff] }
 0x1d6   : > { %v762_v34 = vadd.f32 1.0, %v1776_v19  ;;  %1785 = verf.f32 %v741_v18  ;;  %v880_v18 = vld [vmem:[%s2426_s15 + $0x2b8] sm:$0xff]  ;;  %v1595_v19 = vpack.c.bf16 %v875_v41, %v873_v16  ;;  %v907_v9 = vld [vmem:[%s2426_s15 + $0x390] sm:$0xff] }
 0x1d7   : > { %1787 = verf.f32 %v742_v20  ;;  %v777_v29 = vmul.f32 %v761_v21, %v713_v49  ;;  %v1597_v21 = vpack.c.bf16 %v880_v18, %v878_v17  ;;  %v882_v20 = vld [vmem:[%s2426_s15 + $0x2c8] sm:$0xff]  ;;  %v883_v49 = vld [vmem:[%s2426_s15 + $0x2d0] sm:$0xff]  ;;  %v1627_v41 = vpack.c.bf16 %v907_v9, %v905_v8 }
 0x1d8   : > { %v1778_v24 = vpop.eup %1777  ;;  %v778_v25 = vmul.f32 %v762_v34, %v714_v30  ;;  %v884_v30 = vld [vmem:[%s2426_s15 + $0x2d8] sm:$0xff]  ;;  %v1599_v34 = vpack.c.bf16 %v879_v22, %v877_v14 }
 0x1d9   : > { %v1780_v28 = vpop.eup %1779  ;;  %v765_v35 = vadd.f32 1.0, %v1778_v24  ;;  %v1601_v23 = vpack.c.bf16 %v884_v30, %v882_v20  ;;  %v888_v24 = vld [vmem:[%s2426_s15 + $0x2f8] sm:$0xff]  ;;  %v914_v20 = vld [vmem:[%s2426_s15 + $0x3c8] sm:$0xff] }
 0x1da   : > { %985 = vmatprep.mubr.f32.mxu0 %v778_v25  ;;  %v766_v38 = vadd.f32 1.0, %v1780_v28  ;;  %v1603_v25 = vpack.c.bf16 %v883_v49, %v881_v45  ;;  %v887_v28 = vld [vmem:[%s2426_s15 + $0x2f0] sm:$0xff]  ;;  %v916_v30 = vld [vmem:[%s2426_s15 + $0x3d8] sm:$0xff] }
 0x1db   : > { %986 = vmatmul.mubr.f32.vlgmr.msra.gmra.mrb[0].mxu0 %v777_v29  ;;  %v781_v40 = vmul.f32 %v765_v35, %v717_v58  ;;  %v886_v58 = vld [vmem:[%s2426_s15 + $0x2e8] sm:$0xff]  ;;  %v889_v35 = vld [vmem:[%s2426_s15 + $0x300] sm:$0xff] }
 0x1dc   : > { %v1782_v42 = vpop.eup %1781  ;;  %1580 = vmatpush1.bf16.msra.mxu0 %v1579_v26  ;;  %v782_v46 = vmul.f32 %v766_v38, %v718_v27  ;;  %v1605_v26 = vpack.c.bf16 %v888_v24, %v886_v58  ;;  %v885_v27 = vld [vmem:[%s2426_s15 + $0x2e0] sm:$0xff]  ;;  %v890_v29 = vld [vmem:[%s2426_s15 + $0x308] sm:$0xff]  ;;  %v896_v38 = vld [vmem:[%s2426_s15 + $0x338] sm:$0xff]  ;;  %v1633_v24 = vpack.c.bf16 %v916_v30, %v914_v20 }
 0x1dd   : > { %v1784_v47 = vpop.eup %1783  ;;  %1582 = vmatprep.subr.bf16.mxu0 %v1581_v31  ;;  %v769_v56 = vadd.f32 1.0, %v1782_v42  ;;  %v892_v31 = vld [vmem:[%s2426_s15 + $0x318] sm:$0xff]  ;;  %v1607_v32 = vpack.c.bf16 %v887_v28, %v885_v27  ;;  %v893_v42 = vld [vmem:[%s2426_s15 + $0x320] sm:$0xff] }
 0x1de   : > { %v770_v60 = vadd.f32 1.0, %v1784_v47  ;;  %991 = vmatprep.mubr.f32.mxu0 %v782_v46  ;;  %v1609_v33 = vpack.c.bf16 %v892_v31, %v890_v29  ;;  %v900_v46 = vld [vmem:[%s2426_s15 + $0x358] sm:$0xff]  ;;  %v918_v29 = vld [vmem:[%s2426_s15 + $0x3e8] sm:$0xff] }
 0x1df   : > { %992 = vmatmul.mubr.f32.gmra.mrb[2].mxu0 %v781_v40  ;;  %v785_v62 = vmul.f32 %v769_v56, %v721_v39  ;;  %v1611_v39 = vpack.c.bf16 %v891_v36, %v889_v35  ;;  %v1613_v40 = vpack.c.bf16 %v896_v38, %v894_v37  ;;  %v525_v56 = vsub.s32 2, %v2666_v52  ;;  %v920_v31 = vld [vmem:[%s2426_s15 + $0x3f8] sm:$0xff] }
 0x1e0   : > { %v1786_v63 = vpop.eup %1785  ;;  %1584 = vmatpush1.bf16.msra.mxu0 %v1583_v43  ;;  %v786_v2 = vmul.f32 %v770_v60, %v722_v44  ;;  %v895_v43 = vld [vmem:[%s2426_s15 + $0x330] sm:$0xff]  ;;  %v898_v44 = vld [vmem:[%s2426_s15 + $0x348] sm:$0xff]  ;;  %v529_v60 = vsub.s32 3, %v2666_v52  ;;  %v1637_v38 = vpack.c.bf16 %v920_v31, %v918_v29 }
 0x1e1   : > { %v1788_v3 = vpop.eup %1787  ;;  %1586 = vmatprep.subr.bf16.mxu0 %v1585_v48  ;;  %v773_v7 = vadd.f32 1.0, %v1786_v63  ;;  %v1615_v47 = vpack.c.bf16 %v895_v43, %v893_v42  ;;  %v1617_v48 = vpack.c.bf16 %v900_v46, %v898_v44  ;;  %v901_v63 = vld [vmem:[%s2426_s15 + $0x360] sm:$0xff] }
 0x1e2   : > { %v774_v10 = vadd.f32 1.0, %v1788_v3  ;;  %997 = vmatprep.mubr.f32.mxu0 %v786_v2  ;;  %v906_v2 = vld [vmem:[%s2426_s15 + $0x388] sm:$0xff]  ;;  %v908_v3 = vld [vmem:[%s2426_s15 + $0x398] sm:$0xff] }
 0x1e3   : > { %998 = vmatmul.mubr.f32.gmra.mrb[4].mxu0 %v785_v62  ;;  %v789_v11 = vmul.f32 %v773_v7, %v725_v61  ;;  %v1619_v61 = vpack.c.bf16 %v899_v51, %v897_v50  ;;  %v1621_v62 = vpack.c.bf16 %v904_v59, %v902_v57  ;;  %v1625_v7 = vpack.c.bf16 %v908_v3, %v906_v2 }
 0x1e4   : > { %1588 = vmatpush1.bf16.msra.mxu0 %v1587_v0  ;;  %v790_v13 = vmul.f32 %v774_v10, %v726_v1  ;;  %v903_v0 = vld [vmem:[%s2426_s15 + $0x370] sm:$0xff]  ;;  %v526_v1 = vrot.slane %v2670_v54, %v525_v56 }
 0x1e5   : > { %1590 = vmatprep.subr.bf16.mxu0 %v1589_v4  ;;  %v530_v4 = vrot.slane %v2670_v54, %v529_v60  ;;  %v1623_v5 = vpack.c.bf16 %v903_v0, %v901_v63 }
 0x1e6   : > { %1003 = vmatprep.mubr.f32.mxu0 %v790_v13  ;;  %v912_v13 = vld [vmem:[%s2426_s15 + $0x3b8] sm:$0xff] }
 0x1e7   : > { %1004 = vmatmul.mubr.f32.gmra.mrb[6].mxu0 %v789_v11 }
 0x1e8   : > { %1592 = vmatpush1.bf16.msra.mxu0 %v1591_v12  ;;  %v910_v12 = vld [vmem:[%s2426_s15 + $0x3a8] sm:$0xff] }
 0x1e9   : > { %1594 = vmatprep.subr.bf16.mxu0 %v1593_v15  ;;  %v1629_v18 = vpack.c.bf16 %v912_v13, %v910_v12 }
 0x1ec   : > { %1596 = vmatpush1.bf16.msra.mxu0 %v1595_v19  ;;  %v909_v19 = vld [vmem:[%s2426_s15 + $0x3a0] sm:$0xff] }
 0x1ed   : > { %1598 = vmatprep.subr.bf16.mxu0 %v1597_v21  ;;  %v911_v21 = vld [vmem:[%s2426_s15 + $0x3b0] sm:$0xff] }
 0x1ee   : > { %v1631_v45 = vpack.c.bf16 %v911_v21, %v909_v19 }
 0x1f0   : > { %1600 = vmatpush1.bf16.msra.mxu0 %v1599_v34 }
 0x1f1   : > { %1602 = vmatprep.subr.bf16.mxu0 %v1601_v23 }
 0x1f4   : > { %1604 = vmatpush1.bf16.msra.mxu0 %v1603_v25  ;;  %v913_v25 = vld [vmem:[%s2426_s15 + $0x3c0] sm:$0xff] }
 0x1f5   : > { %1606 = vmatprep.subr.bf16.mxu0 %v1605_v26  ;;  %v915_v26 = vld [vmem:[%s2426_s15 + $0x3d0] sm:$0xff] }
 0x1f6   : > { %v1635_v35 = vpack.c.bf16 %v915_v26, %v913_v25 }
 0x1f8   : > { %1608 = vmatpush1.bf16.msra.mxu0 %v1607_v32 }
 0x1f9   : > { %1610 = vmatprep.subr.bf16.mxu0 %v1609_v33 }
 0x1fc   : > { %1612 = vmatpush1.bf16.msra.mxu0 %v1611_v39  ;;  %v917_v39 = vld [vmem:[%s2426_s15 + $0x3e0] sm:$0xff] }
 0x1fd   : > { %1614 = vmatprep.subr.bf16.mxu0 %v1613_v40  ;;  %v919_v40 = vld [vmem:[%s2426_s15 + $0x3f0] sm:$0xff] }
 0x200   : > { %1616 = vmatpush1.bf16.msra.mxu0 %v1615_v47 }
 0x201   : > { %1618 = vmatprep.subr.bf16.mxu0 %v1617_v48  ;;  %v1639_v48 = vpack.c.bf16 %v919_v40, %v917_v39 }
 0x204   : > { %1620 = vmatpush1.bf16.msra.mxu0 %v1619_v61 }
 0x205   : > { %v690_v6 = vpop.f32.mrb[8].mxu1  ;;  %1622 = vmatprep.subr.bf16.mxu0 %v1621_v62 }
 0x206   : > { %v691_v10 = vadd.f32 %v690_v6, %v526_v1  ;;  %v692_v11 = vpop.f32.mrb[9].mxu1 }
 0x207   : > { %v693_v15 = vadd.f32 %v692_v11, %v530_v4 }
 0x208   : > { %v731_v16 = vmul.f32 0.70710677, %v691_v10  ;;  %1624 = vmatpush1.bf16.msra.mxu0 %v1623_v5  ;;  %v715_v60 = vmul.f32 0.5, %v691_v10 }
 0x209   : > { %v732_v54 = vmul.f32 0.70710677, %v693_v15  ;;  %v696_v17 = vpop.f32.mrb[10].mxu1  ;;  %1626 = vmatprep.subr.bf16.mxu0 %v1625_v7  ;;  %v716_v57 = vmul.f32 0.5, %v693_v15 }
 0x20a   : > { %1789 = verf.f32 %v731_v16  ;;  %v697_v14 = vadd.f32 %v696_v17, %v526_v1  ;;  %v698_v22 = vpop.f32.mrb[11].mxu1 }
 0x20b   : > { %1791 = verf.f32 %v732_v54  ;;  %v699_v34 = vadd.f32 %v698_v22, %v530_v4 }
 0x20c   : > { %v735_v23 = vmul.f32 0.70710677, %v697_v14  ;;  %1628 = vmatpush1.bf16.msra.mxu0 %v1627_v41 }
 0x20d   : > { %v736_v49 = vmul.f32 0.70710677, %v699_v34  ;;  %v702_v58 = vpop.f32.mrb[12].mxu1  ;;  %1630 = vmatprep.subr.bf16.mxu0 %v1629_v18  ;;  %v720_v2 = vmul.f32 0.5, %v699_v34 }
 0x20e   : > { %1793 = verf.f32 %v735_v23  ;;  %v703_v27 = vadd.f32 %v702_v58, %v526_v1  ;;  %v704_v28 = vpop.f32.mrb[13].mxu1 }
 0x20f   : > { %1795 = verf.f32 %v736_v49  ;;  %v705_v32 = vadd.f32 %v704_v28, %v530_v4 }
 0x210   : > { %v739_v33 = vmul.f32 0.70710677, %v703_v27  ;;  %1632 = vmatpush1.bf16.msra.mxu0 %v1631_v45  ;;  %v723_v10 = vmul.f32 0.5, %v703_v27 }
 0x211   : > { %v740_v36 = vmul.f32 0.70710677, %v705_v32  ;;  %v708_v37 = vpop.f32.mrb[14].mxu1  ;;  %1634 = vmatprep.subr.bf16.mxu0 %v1633_v24  ;;  %v724_v11 = vmul.f32 0.5, %v705_v32  ;;  %v1103_v24 = vld [vmem:[%s2894_s23] sm:$0x3] (!%p1368_p6) }
 0x212   : > { %1797 = verf.f32 %v739_v33  ;;  %v709_v42 = vadd.f32 %v708_v37, %v526_v1  ;;  %v710_v43 = vpop.f32.mrb[15].mxu1  ;;  %v1108_v25 = vrot.slane (!%p1368_p6), %v1103_v24, %v517_v53  ;;  %v1112_v26 = vrot.slane (!%p1368_p6), %v1103_v24, %v521_v55 }
 0x213   : > { %1799 = verf.f32 %v740_v36  ;;  %v711_v44 = vadd.f32 %v710_v43, %v530_v4  ;;  %v719_v4 = vmul.f32 0.5, %v697_v14 }
 0x214   : > { %v1790_v46 = vpop.eup %1789  ;;  %v743_v47 = vmul.f32 0.70710677, %v709_v42  ;;  %1636 = vmatpush1.bf16.msra.mxu0 %v1635_v35  ;;  %v727_v19 = vmul.f32 0.5, %v709_v42 }
 0x215   : > { %v1792_v50 = vpop.eup %1791  ;;  %v763_v51 = vadd.f32 1.0, %v1790_v46  ;;  %v744_v56 = vmul.f32 0.70710677, %v711_v44  ;;  %1638 = vmatprep.subr.bf16.mxu0 %v1637_v38  ;;  %v728_v17 = vmul.f32 0.5, %v711_v44 }
 0x216   : > { %v764_v59 = vadd.f32 1.0, %v1792_v50  ;;  %1801 = verf.f32 %v743_v47 }
 0x217   : > { %1803 = verf.f32 %v744_v56  ;;  %v779_v0 = vmul.f32 %v763_v51, %v715_v60 }
 0x218   : > { %v1794_v61 = vpop.eup %1793  ;;  %1640 = vmatpush1.bf16.msra.mxu0 %v1639_v48  ;;  %v780_v62 = vmul.f32 %v764_v59, %v716_v57 }
 0x219   : > { %v1796_v63 = vpop.eup %1795  ;;  %v767_v1 = vadd.f32 1.0, %v1794_v61 }
 0x21a   : > { %v768_v3 = vadd.f32 1.0, %v1796_v63  ;;  %1074 = vmatprep.mubr.f32.mxu0 %v780_v62 }
 0x21b   : > { %1075 = vmatmul.mubr.f32.vlgmr.msra.gmra.mrb[0].mxu0 %v779_v0  ;;  %v783_v9 = vmul.f32 %v767_v1, %v719_v4 }
 0x21c   : > { %v1798_v5 = vpop.eup %1797  ;;  %v784_v6 = vmul.f32 %v768_v3, %v720_v2 }
 0x21d   : > { %v1800_v7 = vpop.eup %1799  ;;  %v771_v8 = vadd.f32 1.0, %v1798_v5 }
 0x21e   : > { %v772_v12 = vadd.f32 1.0, %v1800_v7  ;;  %1080 = vmatprep.mubr.f32.mxu0 %v784_v6 }
 0x21f   : > { %1081 = vmatmul.mubr.f32.gmra.mrb[2].mxu0 %v783_v9  ;;  %v787_v54 = vmul.f32 %v771_v8, %v723_v10 }
 0x220   : > { %v1802_v13 = vpop.eup %1801  ;;  %v788_v15 = vmul.f32 %v772_v12, %v724_v11 }
 0x221   : > { %v1804_v16 = vpop.eup %1803  ;;  %v775_v41 = vadd.f32 1.0, %v1802_v13 }
 0x222   : > { %v776_v18 = vadd.f32 1.0, %v1804_v16  ;;  %1086 = vmatprep.mubr.f32.mxu0 %v788_v15 }
 0x223   : > { %1087 = vmatmul.mubr.f32.gmra.mrb[4].mxu0 %v787_v54  ;;  %v791_v14 = vmul.f32 %v775_v41, %v727_v19 }
 0x224   : > { %v792_v21 = vmul.f32 %v776_v18, %v728_v17 }
 0x226   : > { %1092 = vmatprep.mubr.f32.mxu0 %v792_v21 }
 0x227   : > { %1093 = vmatmul.mubr.f32.gmra.mrb[6].mxu0 %v791_v14 }
 0x2ee   : > { %v1076_v22 = vpop.f32.mrb[0].mxu0 }
 0x2ef   : > { %v1078_v20 = vpop.f32.mrb[1].mxu0  ;;  %v1115_v27 = vadd.f32 (!%p1368_p6), %v1108_v25, %v1076_v22 }
 0x2f0   : > { %v1116_v28 = vadd.f32 (!%p1368_p6), %v1112_v26, %v1078_v20 }
 0x2f1   : > { %1123 = vst [vmem:[#allocation2] sm:$0xff] (!%p1368_p6), %v1115_v27 }
 0x2f2   : > { %v1082_v30 = vpop.f32.mrb[2].mxu0  ;;  %1124 = vst [vmem:[#allocation2 + $0x8] sm:$0xff] (!%p1368_p6), %v1116_v28 }
 0x2f3   : > { %v1084_v34 = vpop.f32.mrb[3].mxu0  ;;  %v1117_v29 = vadd.f32 (!%p1368_p6), %v1108_v25, %v1082_v30 }
 0x2f4   : > { %v1118_v31 = vadd.f32 (!%p1368_p6), %v1112_v26, %v1084_v34 }
 0x2f5   : > { %1102 = sbr.rel (%p1368_p6) target bundleno = 767 (0x2ff), region = 60  ;;  %1125 = vst [vmem:[#allocation2 + $0x10] sm:$0xff] (!%p1368_p6), %v1117_v29 }
 0x2f6   : > { %v1088_v23 = vpop.f32.mrb[4].mxu0  ;;  %1126 = vst [vmem:[#allocation2 + $0x18] sm:$0xff] (!%p1368_p6), %v1118_v31 }
 0x2f7   : > { %v1090_v45 = vpop.f32.mrb[5].mxu0  ;;  %v1119_v32 = vadd.f32 (!%p1368_p6), %v1108_v25, %v1088_v23 }
 0x2f8   : > { %v1120_v33 = vadd.f32 (!%p1368_p6), %v1112_v26, %v1090_v45 }
 0x2f9   : > { %1127 = vst [vmem:[#allocation2 + $0x20] sm:$0xff] (!%p1368_p6), %v1119_v32 }
 0x2fa   : > { %v1094_v49 = vpop.f32.mrb[6].mxu0  ;;  %1128 = vst [vmem:[#allocation2 + $0x28] sm:$0xff] (!%p1368_p6), %v1120_v33 }
 0x2fb   : > { %v1096_v58 = vpop.f32.mrb[7].mxu0  ;;  %v1121_v35 = vadd.f32 (!%p1368_p6), %v1108_v25, %v1094_v49 }
 0x2fc   : > { %v1122_v36 = vadd.f32 %v1112_v26, %v1096_v58 }
 0x2fd   : > { %1129 = vst [vmem:[#allocation2 + $0x30] sm:$0xff] %v1121_v35 }
 0x2fe   : > { %1130 = vst [vmem:[#allocation2 + $0x38] sm:$0xff] %v1122_v36 }
 0x2ff PF: > { %p1369_p4 = scmp.le.s32.totalorder %s2039_s24, 0 }
 0x300   : > { %v1135_v52 = vld [vmem:[#allocation2] sm:$0xff] (!%p1369_p4)  ;;  %v1136_v53 = vld [vmem:[#allocation2 + $0x8] sm:$0xff] (!%p1369_p4)  ;;  %v1137_v55 = vld [vmem:[#allocation2 + $0x10] sm:$0xff] (!%p1369_p4) }
 0x301   : > { %1134 = sbr.rel (%p1369_p4) target bundleno = 777 (0x309), region = 64  ;;  %v1143_v37 = vadd.f32 (!%p1369_p4), %v1135_v52, %v1076_v22  ;;  %v1144_v38 = vadd.f32 (!%p1369_p4), %v1136_v53, %v1078_v20  ;;  %v1145_v39 = vadd.f32 (!%p1369_p4), %v1137_v55, %v1082_v30  ;;  %v1138_v40 = vld [vmem:[#allocation2 + $0x18] sm:$0xff] (!%p1369_p4) }
 0x302   : > { %v1146_v44 = vadd.f32 (!%p1369_p4), %v1138_v40, %v1084_v34 }
 0x303   : > { %v1139_v42 = vld [vmem:[#allocation2 + $0x20] sm:$0xff] (!%p1369_p4)  ;;  %1151 = vst [vmem:[#allocation2] sm:$0xff] (!%p1369_p4), %v1143_v37  ;;  %1152 = vst [vmem:[#allocation2 + $0x8] sm:$0xff] (!%p1369_p4), %v1144_v38 }
 0x304   : > { %v1140_v43 = vld [vmem:[#allocation2 + $0x28] sm:$0xff] (!%p1369_p4)  ;;  %v1147_v46 = vadd.f32 (!%p1369_p4), %v1139_v42, %v1088_v23  ;;  %v1141_v48 = vld [vmem:[#allocation2 + $0x30] sm:$0xff] (!%p1369_p4)  ;;  %1153 = vst [vmem:[#allocation2 + $0x10] sm:$0xff] (!%p1369_p4), %v1145_v39  ;;  %1154 = vst [vmem:[#allocation2 + $0x18] sm:$0xff] (!%p1369_p4), %v1146_v44 }
 0x305   : > { %v1148_v47 = vadd.f32 (!%p1369_p4), %v1140_v43, %v1090_v45  ;;  %v1142_v50 = vld [vmem:[#allocation2 + $0x38] sm:$0xff] (!%p1369_p4)  ;;  %v1149_v51 = vadd.f32 (!%p1369_p4), %v1141_v48, %v1094_v49 }
 0x306   : > { %v1150_v56 = vadd.f32 (!%p1369_p4), %v1142_v50, %v1096_v58  ;;  %1155 = vst [vmem:[#allocation2 + $0x20] sm:$0xff] (!%p1369_p4), %v1147_v46 }
 0x307   : > { %1156 = vst [vmem:[#allocation2 + $0x28] sm:$0xff] (!%p1369_p4), %v1148_v47  ;;  %1157 = vst [vmem:[#allocation2 + $0x30] sm:$0xff] (!%p1369_p4), %v1149_v51 }
 0x308   : > { %1158 = vst [vmem:[#allocation2 + $0x38] sm:$0xff] %v1150_v56 }
 0x309 PF: > { %p1370_p12 = scmp.ne.s32.totalorder %s2039_s24, 1 }
 0x30b   : > { %1162 = sbr.rel (%p1370_p12) target bundleno = 786 (0x312), region = 68  ;;  %v1163_v57 = vld [vmem:[#allocation2] sm:$0xff] (!%p1370_p12)  ;;  %v1164_v59 = vld [vmem:[#allocation2 + $0x8] sm:$0xff] (!%p1370_p12) }
 0x30c   : > { %v1165_v60 = vld [vmem:[#allocation2 + $0x10] sm:$0xff] (!%p1370_p12)  ;;  %1171 = vst [vmem:[%s2747_s25] sm:$0xff] (!%p1370_p12), %v1163_v57  ;;  %1172 = vst [vmem:[%s2747_s25 + $0x8] sm:$0xff] (!%p1370_p12), %v1164_v59  ;;  %v1166_v61 = vld [vmem:[#allocation2 + $0x18] sm:$0xff] (!%p1370_p12) }
 0x30d   : > { %1173 = vst [vmem:[%s2747_s25 + $0x10] sm:$0xff] (!%p1370_p12), %v1165_v60  ;;  %1174 = vst [vmem:[%s2747_s25 + $0x18] sm:$0xff] (!%p1370_p12), %v1166_v61 }
 0x30e   : > { %v1167_v62 = vld [vmem:[#allocation2 + $0x20] sm:$0xff] (!%p1370_p12) }
 0x30f   : > { %v1168_v63 = vld [vmem:[#allocation2 + $0x28] sm:$0xff] (!%p1370_p12)  ;;  %1175 = vst [vmem:[%s2747_s25 + $0x20] sm:$0xff] (!%p1370_p12), %v1167_v62  ;;  %v1169_v0 = vld [vmem:[#allocation2 + $0x30] sm:$0xff] (!%p1370_p12)  ;;  %v1170_v1 = vld [vmem:[#allocation2 + $0x38] sm:$0xff] (!%p1370_p12) }
 0x310   : > { %1176 = vst [vmem:[%s2747_s25 + $0x28] sm:$0xff] (!%p1370_p12), %v1168_v63  ;;  %1177 = vst [vmem:[%s2747_s25 + $0x30] sm:$0xff] (!%p1370_p12), %v1169_v0 }
 0x311   : > { %1178 = vst [vmem:[%s2747_s25 + $0x38] sm:$0xff] (!%p1370_p12), %v1170_v1 }
 0x312 PF: > { %s2895_s24 = sld [smem:[#allocation18_spill]]  ;;  %s1194_s7 = sshll.u32 %s2747_s25, 4  ;;  %s2774_s7 = int_to_ptr.vmem [resolvable:$true] %s1194_s7 }
 0x313   : > { %s2896_s1 = sld [smem:[#allocation28_spill]]  ;;  %s1180_s14 = scalar_lea.sflag [#allocation5], %s2404_s17 }
 0x314   : > { %s1925_s0 = scalar_lea.vmem %s2774_s7, 1024  ;;  %p2897_p5 = scmp.ne.s32.totalorder %s2882_s4, 0 }
 0x315   : > { %p1926_p11 = scmp.ne.s32.totalorder %s2774_s7, %s1925_s0  ;;  %s2066_s6 = smov [#allocation11]  }
 0x316   : > { %s1929_s30 = sshll.u32 %s2066_s6, 4  ;;  %s1930_s30 = int_to_ptr.vmem [resolvable:$false] %s1929_s30 }
 0x317   : > { %p1927_p3 = pnand %p1926_p11, %p2897_p5  ;;  %s1931_s20 = scalar_lea.vmem %s1930_s30, 2048 }
 0x318   : > { %s1384_s12 = sshll.u32 %s2895_s24, 10  ;;  %p1932_p2 = scmp.lt.s32.totalorder %s2774_s7, %s1930_s30 }
 0x319   : > { %s2771_s9 = scalar_lea.hbm %s2896_s1, %s1384_s12  ;;  %p1928_p9 = pneg %p1927_p3 }
 0x31a   : > { %p1933_p0 = scmp.lt.s32.totalorder %s1931_s20, %s1925_s0 }
 0x31c   : > { %p1934_p10 = por %p1933_p0, %p1932_p2 }
 0x31e   : > { %p1935_p7 = pnand %p1934_p10, %p1928_p9 }
 0x320   : > { %1938 = shalt.err (!%p1935_p7)
}
 0x321   : > { %s1939_s18 = scalar_lea.hbm %s2771_s9, 1024  ;;  %s1943_s29 = scalar_lea.hbm %s2896_s1, 2048 }
 0x322   : > { %p1940_p8 = scmp.ne.s32.totalorder %s2771_s9, %s1939_s18  ;;  %p1944_p6 = scmp.lt.u32.totalorder %s2771_s9, %s2896_s1 }
 0x323   : > { %p1945_p4 = scmp.lt.u32.totalorder %s1943_s29, %s1939_s18  ;;  %p1947_p11 = scmp.lt.u32.totalorder %s1939_s18, %s2771_s9 }
 0x324   : > { %p1941_p1 = pnand %p1940_p8, %p2897_p5 }
 0x325   : > { %p1946_p12 = por %p1945_p4, %p1944_p6 }
 0x326   : > { %p1942_p13 = pneg %p1941_p1 }
 0x327   : > { %p1948_p3 = por %p1947_p11, %p1946_p12 }
 0x329   : > { %p1949_p9 = pnand %p1948_p3, %p1942_p13 }
 0x32b   : > { %1952 = shalt.err (!%p1949_p9)
}
 0x32c   : > { %s2067_s25 = smov 256   ;;  %s2068_s8 = smov 16  }
 0x32d   : > { %1657 = dma.vmem_to_hbm [thread:$0]  (%p2897_p5), %s2774_s7, 1024, %s2771_s9, %s1180_s14, %s2067_s25, %s2067_s25, %s2068_s8  }
 0x32e PF: > { %s2898_s13 = sld [smem:[#allocation24_spill]]  ;;  %p1677_p2 = scmp.ge.s32.totalorder %s2055_s28, 2 }
 0x32f   : > { %s1209_s23 = sand.u32 1, %s2027_s21  }
 0x330   : > { %s1210_s24 = scalar_lea.sflag [#allocation5], %s1209_s23 }
 0x334   : > { %p2899_p0 = scmp.ne.s32.totalorder %s2898_s13, 0 }
 0x336   : > { %p1673_p10 = pnand %p1677_p2, %p2899_p0 }
 0x338   : > { %2010 = dma.done.wait (!%p1673_p10), %s1210_s24, 1024  }
 0x339   : > { %2012 = vsyncadd (!%p1673_p10), %s1210_s24, 4294966272  ;;  %s27_s28 = sadd.s32 1, %s2055_s28   ;;  %s2900_s12 = sld [smem:[#allocation16_spill]] }
 0x33a   : > { %p24_p7 = scmp.ge.s32.totalorder %s27_s28, 6   ;;  %s2901_s20 = sld [smem:[#allocation22_spill]] }
 0x33b   : > { %s2902_s4 = sld [smem:[#allocation17_spill]]  ;;  %s2903_s23 = sld [smem:[#allocation23_spill]] }
 0x33c   : > { %s2904_s25 = sld [smem:[#allocation19_spill]]  ;;  %s2905_s17 = sld [smem:[#allocation20_spill]] }
 0x33d   : > { %s2906_s27 = sld [smem:[#allocation21_spill]]  ;;  %s2907_s18 = smov %s2019_s19 }
 0x33e   : > { %s2909_s21 = smov %s2031_s22  ;;  %s2911_s24 = smov %s2047_s26 }
 0x33f   : > { %s2908_s19 = smov %s2900_s12  ;;  %26 = sbr.rel (!%p24_p7) target bundleno = 18 (0x12), region = 134 }
 0x341   : > { %s2910_s22 = smov %s2902_s4 }
 0x342   : > { %s2912_s26 = smov %s2905_s17 }
 0x346   :  { %1215 = vsyncpa [#allocation4], 1 }
 0x347   :  { %1217 = vsyncpa [#allocation4 + $0x1], 1 }
 0x348   :  { %1218 = vsyncpa [#allocation7], 1 }
 0x349   :  { %1220 = vsyncpa [#allocation7 + $0x1], 1 }
 0x34a   :  { %1221 = vsyncpa [#allocation10], 1 }
 0x34b   :  { %1223 = vsyncpa [#allocation10 + $0x1], 1 }
 0x34c   :  { %1224 = vsyncpa [#allocation5], 1 }
 0x34d   :  { %1226 = vsyncpa [#allocation5 + $0x1], 1 }

</bundles_post_ra>
